<compile_context>
chip_gen: v6e
topology: v6e:2x2x1
jax: 0.10.0
libtpu: 0.0.40
codegen_flags: <defaults>
</compile_context>

<pallas_src>
import math
from functools import partial

import jax
import jax.numpy as jnp
from jax.experimental import pallas as pl
from jax.experimental.pallas import tpu as pltpu

_INV_SQRT2 = 1.0 / math.sqrt(2.0)


def _round_up(x, m):
    return ((x + m - 1) // m) * m


# --------------------------------------------------------------------------
# Kernel body: one row-tile of x through Linear -> GELU -> Linear.
# --------------------------------------------------------------------------
def _ffn_kernel(x_ref, w1_ref, b1_ref, w2_ref, b2_ref, o_ref):
    # x_ref : (tm, dim_p)    compute dtype (bf16)
    # w1_ref: (dim_p, hid_p) compute dtype
    # b1_ref: (1, hid_p)     f32
    # w2_ref: (hid_p, dim_p) compute dtype
    # b2_ref: (1, dim_p)     f32
    # o_ref : (tm, dim_p)    output dtype (f32)
    h = jnp.dot(x_ref[...], w1_ref[...], preferred_element_type=jnp.float32)
    h = h + b1_ref[...]
    # Exact GELU (erf form) in f32 — matches torch.nn.GELU() default.
    h = 0.5 * h * (1.0 + jax.lax.erf(h * _INV_SQRT2))
    # Feed the second MXU pass its native dtype; halves the largest live slab.
    h = h.astype(w2_ref.dtype)
    y = jnp.dot(h, w2_ref[...], preferred_element_type=jnp.float32)
    y = y + b2_ref[...]
    o_ref[...] = y.astype(o_ref.dtype)


# --------------------------------------------------------------------------
# Hardware-dependent knobs.
# --------------------------------------------------------------------------
def _chip_info():
    try:
        kind = jax.devices()[0].device_kind.lower()
    except Exception:  # no device query available
        kind = ""
    old_gen = any(t in kind for t in ("v2", "v3", "v4", "v5"))
    feat_align = 128 if old_gen else 256        # MXU panel width (v6e/v7x: 256)
    is_v7 = ("v7" in kind) or ("7x" in kind)
    num_tc = 2 if is_v7 else 1                  # v7x: 2 TensorCores/chip
    big_tile = 256 if is_v7 else 512            # v7x has only 64 MiB VMEM/TC
    try:
        vmem_cap = pltpu.get_tpu_info().vmem_capacity_bytes
    except Exception:
        vmem_cap = 64 * 2**20                   # conservative fallback
    return feat_align, num_tc, big_tile, vmem_cap


def _pick_row_tile(M, num_tc, big_tile):
    sub = 16  # bf16 sublane packing: keep x/out tiles vreg-dense
    if num_tc == 1:
        # Single TensorCore: one grid step is cheapest for small problems
        # (weights resident, nothing worth pipelining at these sizes).
        return big_tile if M > big_tile else max(sub, _round_up(M, sub))
    # v7x: keep >= 2 grid steps so both TensorCores get work.
    tile = big_tile
    while tile > sub and M < 2 * tile:
        tile //= 2
    return max(tile, sub)


# --------------------------------------------------------------------------
# pallas_call wrapper.
# --------------------------------------------------------------------------
def _pallas_ffn(x2d, w1, b1, w2, b2, *, row_tile, out_dtype, vmem_limit_bytes,
                cost_estimate, single_buffer_weights):
    M, dim_p = x2d.shape
    hid_p = w1.shape[1]
    grid = (pl.cdiv(M, row_tile),)  # ragged last block: OOB rows masked on write

    def const_spec(shape):
        if single_buffer_weights:
            # Constant index_map: keep exactly one resident copy in VMEM.
            return pl.BlockSpec(shape, lambda i: (0, 0),
                                pipeline_mode=pl.Buffered(1))
        return pl.BlockSpec(shape, lambda i: (0, 0))

    return pl.pallas_call(
        _ffn_kernel,
        out_shape=jax.ShapeDtypeStruct((M, dim_p), out_dtype),
        grid_spec=pltpu.PrefetchScalarGridSpec(
            num_scalar_prefetch=0,
            grid=grid,
            in_specs=[
                pl.BlockSpec((row_tile, dim_p), lambda i: (i, 0)),  # x rows
                const_spec((dim_p, hid_p)),                         # W1
                const_spec((1, hid_p)),                             # b1
                const_spec((hid_p, dim_p)),                         # W2
                const_spec((1, dim_p)),                             # b2
            ],
            out_specs=pl.BlockSpec((row_tile, dim_p), lambda i: (i, 0)),
        ),
        compiler_params=pltpu.CompilerParams(
            dimension_semantics=("parallel",),
            vmem_limit_bytes=vmem_limit_bytes,
        ),
        cost_estimate=cost_estimate,
    )(x2d, w1, b1, w2, b2)


def feed_forward(x, w1, b1, w2, b2, *, row_tile=None,
                 compute_dtype=jnp.bfloat16):
    """x: (B, N, dim). w1: (dim, hidden), b1: (hidden,), w2: (hidden, dim),
    b2: (dim,). Returns (B, N, dim) in x.dtype."""
    B, N, dim = x.shape
    hidden = w1.shape[1]
    out_dtype = x.dtype
    M = B * N

    feat_align, num_tc, big_tile, vmem_cap = _chip_info()

    # Lane/MXU-dense feature padding. Zero padding is exact: padded hidden
    # cols give h=0 (b1 pad is 0), GELU(0)=0, and contribute 0 to the 2nd dot.
    dim_p = _round_up(dim, feat_align)
    hid_p = _round_up(hidden, feat_align)

    if row_tile is None:
        row_tile = _pick_row_tile(M, num_tc, big_tile)
    assert row_tile % 16 == 0, "row_tile must be a multiple of 16 (bf16 packing)"

    # Pad feature axes only; the row axis stays ragged (no extra HBM copy).
    x2d = x.reshape(M, dim).astype(compute_dtype)
    x2d_p = jnp.pad(x2d, ((0, 0), (0, dim_p - dim))) if dim_p != dim else x2d
    w1_p = jnp.pad(w1.astype(compute_dtype),
                   ((0, dim_p - dim), (0, hid_p - hidden)))
    w2_p = jnp.pad(w2.astype(compute_dtype),
                   ((0, hid_p - hidden), (0, dim_p - dim)))
    b1_p = jnp.pad(b1.astype(jnp.float32), (0, hid_p - hidden)).reshape(1, hid_p)
    b2_p = jnp.pad(b2.astype(jnp.float32), (0, dim_p - dim)).reshape(1, dim_p)

    # VMEM budget (double-buffered x/out tiles, resident weights, f32 slabs),
    # capped at ~75% of this generation's physical VMEM per core.
    cbytes = jnp.dtype(compute_dtype).itemsize
    obytes = jnp.dtype(out_dtype).itemsize
    w_bytes = (dim_p * hid_p + hid_p * dim_p) * cbytes + (hid_p + dim_p) * 4
    act_bytes = row_tile * (2 * dim_p * cbytes      # x tiles (x2 buffers)
                            + 2 * dim_p * obytes    # out tiles (x2 buffers)
                            + hid_p * (4 + cbytes)  # f32 h + cast h
                            + dim_p * 4)            # f32 y before cast
    need = 2 * w_bytes + act_bytes
    vmem_limit = int(min(int(vmem_cap * 0.75), max(32 * 2**20, 2 * need)))

    cost = pl.CostEstimate(
        flops=4 * M * dim_p * hid_p,            # two matmuls
        transcendentals=M * hid_p,              # erf
        bytes_accessed=M * dim_p * (cbytes + obytes) + w_bytes,
    )

    call = partial(_pallas_ffn, x2d_p, w1_p, b1_p, w2_p, b2_p,
                   row_tile=row_tile, out_dtype=out_dtype,
                   vmem_limit_bytes=vmem_limit, cost_estimate=cost)
    try:
        out2d = call(single_buffer_weights=True)
    except (TypeError, NotImplementedError, pltpu.LoweringException):
        # Only the Buffered(1)-unsupported case falls back; real compile/VMEM
        # errors propagate instead of being retried with a heavier config.
        # TODO(synk): for very large ViT dims on v7x (64 MiB VMEM), switch this
        # fallback to memory_space=pl.ANY weights + one-shot DMA into scratch.
        out2d = call(single_buffer_weights=False)

    out2d = out2d[:, :dim] if dim_p != dim else out2d
    return out2d.reshape(B, N, dim)


if __name__ == "__main__":
    # Small ViT-like shapes: (batch, tokens, dim), hidden = 2*dim.
    # N=120 -> M=240 rows, exercising the ragged row grid and feature padding.
    B, N, dim, hidden = 2, 120, 32, 64

    key = jax.random.PRNGKey(0)
    kx, kw1, kb1, kw2, kb2 = jax.random.split(key, 5)

    x = jax.random.normal(kx, (B, N, dim), dtype=jnp.float32)

    # torch.nn.Linear-style uniform init; weights stored (in, out) so the
    # kernel computes x @ W (torch stores (out, in)).
    bound1 = 1.0 / math.sqrt(dim)
    bound2 = 1.0 / math.sqrt(hidden)
    w1 = jax.random.uniform(kw1, (dim, hidden), jnp.float32, -bound1, bound1)
    b1 = jax.random.uniform(kb1, (hidden,), jnp.float32, -bound1, bound1)
    w2 = jax.random.uniform(kw2, (hidden, dim), jnp.float32, -bound2, bound2)
    b2 = jax.random.uniform(kb2, (dim,), jnp.float32, -bound2, bound2)

    out = jax.block_until_ready(feed_forward(x, w1, b1, w2, b2))
    assert out.shape == (B, N, dim)
    assert out.dtype == x.dtype

    # Reference mirroring the kernel's precision (bf16 matmul inputs, f32 acc).
    def ref_mixed(x, w1, b1, w2, b2):
        cd = jnp.bfloat16
        h = jnp.dot(x.astype(cd), w1.astype(cd),
                    preferred_element_type=jnp.float32) + b1
        h = 0.5 * h * (1.0 + jax.lax.erf(h * _INV_SQRT2))
        return jnp.dot(h.astype(cd), w2.astype(cd),
                       preferred_element_type=jnp.float32) + b2

    # Pure f32 reference == the PyTorch module's math.
    def ref_f32(x, w1, b1, w2, b2):
        h = x @ w1 + b1
        h = 0.5 * h * (1.0 + jax.lax.erf(h * _INV_SQRT2))
        return h @ w2 + b2

    r_mixed = ref_mixed(x, w1, b1, w2, b2)
    r_f32 = ref_f32(x, w1, b1, w2, b2)
    assert jnp.allclose(out, r_mixed, atol=1e-4, rtol=1e-4), \
        "mismatch vs mixed-precision reference"
    assert jnp.allclose(out, r_f32, atol=5e-2, rtol=5e-2), \
        "mismatch vs f32 reference"

    print("KERNEL_OK")
</pallas_src>

<mosaic_0001>
module attributes {stable_mosaic.version = 11 : i64} {
  func.func @_ffn_kernel(%arg0: i32, %arg1: memref<240x256xbf16, #tpu.memory_space<vmem>>, %arg2: memref<256x256xbf16, #tpu.memory_space<vmem>>, %arg3: memref<1x256xf32, #tpu.memory_space<vmem>>, %arg4: memref<256x256xbf16, #tpu.memory_space<vmem>>, %arg5: memref<1x256xf32, #tpu.memory_space<vmem>>, %arg6: memref<240x256xf32, #tpu.memory_space<vmem>>) attributes {dimension_semantics = [#tpu.dimension_semantics<parallel>], iteration_bounds = array<i64: 1>, scalar_prefetch = 0 : i64, scratch_operands = 0 : i64, tpu.core_type = #tpu.core_type<tc>, window_params = [{transform_indices = @transform_0, window_bounds = array<i64: 240, 256>}, {pipeline_mode = #tpu.pipeline_mode<synchronous>, transform_indices = @transform_1, window_bounds = array<i64: 256, 256>}, {pipeline_mode = #tpu.pipeline_mode<synchronous>, transform_indices = @transform_2, window_bounds = array<i64: 1, 256>}, {pipeline_mode = #tpu.pipeline_mode<synchronous>, transform_indices = @transform_3, window_bounds = array<i64: 256, 256>}, {pipeline_mode = #tpu.pipeline_mode<synchronous>, transform_indices = @transform_4, window_bounds = array<i64: 1, 256>}, {transform_indices = @transform_5, window_bounds = array<i64: 240, 256>}]} {
    %c0 = arith.constant 0 : index
    %c0_0 = arith.constant 0 : index
    %0 = vector.load %arg1[%c0, %c0_0] : memref<240x256xbf16, #tpu.memory_space<vmem>>, vector<240x256xbf16>
    %c0_1 = arith.constant 0 : index
    %c0_2 = arith.constant 0 : index
    %1 = vector.load %arg2[%c0_1, %c0_2] : memref<256x256xbf16, #tpu.memory_space<vmem>>, vector<256x256xbf16>
    %cst = arith.constant dense<0.000000e+00> : vector<240x256xf32>
    %2 = tpu.matmul %0, %1, %cst {dimension_numbers = #tpu.dot_dimension_numbers<[1], [0], [0], [1], [0, 0, 1, 1], [], []>} : vector<240x256xbf16>, vector<256x256xbf16>, vector<240x256xf32> -> vector<240x256xf32>
    %c0_3 = arith.constant 0 : index
    %c0_4 = arith.constant 0 : index
    %3 = vector.load %arg3[%c0_3, %c0_4] : memref<1x256xf32, #tpu.memory_space<vmem>>, vector<1x256xf32>
    %4 = vector.broadcast %3 : vector<1x256xf32> to vector<240x256xf32>
    %5 = arith.addf %2, %4 : vector<240x256xf32>
    %cst_5 = arith.constant 5.000000e-01 : f32
    %6 = vector.broadcast %cst_5 : f32 to vector<240x256xf32>
    %7 = arith.mulf %6, %5 : vector<240x256xf32>
    %cst_6 = arith.constant 0.707106769 : f32
    %8 = vector.broadcast %cst_6 : f32 to vector<240x256xf32>
    %9 = arith.mulf %5, %8 : vector<240x256xf32>
    %10 = math.erf %9 : vector<240x256xf32>
    %cst_7 = arith.constant 1.000000e+00 : f32
    %11 = vector.broadcast %cst_7 : f32 to vector<240x256xf32>
    %12 = arith.addf %11, %10 : vector<240x256xf32>
    %13 = arith.mulf %7, %12 : vector<240x256xf32>
    %14 = arith.truncf %13 : vector<240x256xf32> to vector<240x256xbf16>
    %c0_8 = arith.constant 0 : index
    %c0_9 = arith.constant 0 : index
    %15 = vector.load %arg4[%c0_8, %c0_9] : memref<256x256xbf16, #tpu.memory_space<vmem>>, vector<256x256xbf16>
    %cst_10 = arith.constant dense<0.000000e+00> : vector<240x256xf32>
    %16 = tpu.matmul %14, %15, %cst_10 {dimension_numbers = #tpu.dot_dimension_numbers<[1], [0], [0], [1], [0, 0, 1, 1], [], []>} : vector<240x256xbf16>, vector<256x256xbf16>, vector<240x256xf32> -> vector<240x256xf32>
    %c0_11 = arith.constant 0 : index
    %c0_12 = arith.constant 0 : index
    %17 = vector.load %arg5[%c0_11, %c0_12] : memref<1x256xf32, #tpu.memory_space<vmem>>, vector<1x256xf32>
    %18 = vector.broadcast %17 : vector<1x256xf32> to vector<240x256xf32>
    %19 = arith.addf %16, %18 : vector<240x256xf32>
    %c0_13 = arith.constant 0 : index
    %c0_14 = arith.constant 0 : index
    %20 = vector.load %arg6[%c0_13, %c0_14] : memref<240x256xf32, #tpu.memory_space<vmem>>, vector<240x256xf32>
    tpu.vector_store %arg6[%c0_13, %c0_14], %19 {strides = array<i32>} : memref<240x256xf32, #tpu.memory_space<vmem>>, vector<240x256xf32>,
    return
  }
  func.func @transform_0(%arg0: i32) -> (i32, i32) {
    %c0_i32 = arith.constant 0 : i32
    %c0_i32_0 = arith.constant 0 : i32
    return %arg0, %c0_i32 : i32, i32
  }
  func.func @transform_1(%arg0: i32) -> (i32, i32) {
    %c0_i32 = arith.constant 0 : i32
    %c0_i32_0 = arith.constant 0 : i32
    %c0_i32_1 = arith.constant 0 : i32
    return %c0_i32, %c0_i32_0 : i32, i32
  }
  func.func @transform_2(%arg0: i32) -> (i32, i32) {
    %c0_i32 = arith.constant 0 : i32
    %c0_i32_0 = arith.constant 0 : i32
    %c0_i32_1 = arith.constant 0 : i32
    return %c0_i32, %c0_i32_0 : i32, i32
  }
  func.func @transform_3(%arg0: i32) -> (i32, i32) {
    %c0_i32 = arith.constant 0 : i32
    %c0_i32_0 = arith.constant 0 : i32
    %c0_i32_1 = arith.constant 0 : i32
    return %c0_i32, %c0_i32_0 : i32, i32
  }
  func.func @transform_4(%arg0: i32) -> (i32, i32) {
    %c0_i32 = arith.constant 0 : i32
    %c0_i32_0 = arith.constant 0 : i32
    %c0_i32_1 = arith.constant 0 : i32
    return %c0_i32, %c0_i32_0 : i32, i32
  }
  func.func @transform_5(%arg0: i32) -> (i32, i32) {
    %c0_i32 = arith.constant 0 : i32
    %c0_i32_0 = arith.constant 0 : i32
    return %arg0, %c0_i32 : i32, i32
  }
}

</mosaic_0001>

<bundles_post_ra>
// kernel: tpu_custom_call.1
= control target key start
LH: loop header
LB: loop body
LE: loop exit
PB: predicated region body
PF: predicated region fallthrough
CT: control target
= control target key end

     0   :  { %10 = vsyncpa [#allocation3], 0  ;;  %s2273_s0 = inlined_call_operand.hbm [shape: bf16[240,256], index: 0, kind: input, shape index: {}]   ;;  %s2274_s1 = inlined_call_operand.hbm [shape: bf16[256,256], index: 1, kind: input, shape index: {}]   ;;  %s2275_s2 = inlined_call_operand.vmem [shape: f32[1,256], index: 2, kind: input, shape index: {}]   ;;  %s2276_s3 = inlined_call_operand.hbm [shape: bf16[256,256], index: 3, kind: input, shape index: {}]   ;;  %s2277_s4 = inlined_call_operand.vmem [shape: f32[1,256], index: 4, kind: input, shape index: {}]   ;;  %s2278_s5 = inlined_call_operand.hbm [shape: f32[240,256], index: 5, kind: output, shape index: {}]  }
   0x1   :  { %11 = vsyncpa [#allocation6], 0 }
   0x2   :  { %12 = vsyncpa [#allocation4], 0  ;;  %s1873_s18 = smov [#allocation5]   ;;  %s1874_s20 = smov [#allocation2]  }
   0x3   :  { %s30_s19 = sshll.u32 %s1873_s18, 4  ;;  %s18_s21 = sshll.u32 %s1874_s20, 4  ;;  %s31_s19 = int_to_ptr.vmem [resolvable:$true] %s30_s19  ;;  %s19_s21 = int_to_ptr.vmem [resolvable:$true] %s18_s21 }
   0x4   :  { %s1795_s22 = scalar_lea.vmem %s31_s19, 4096  ;;  %p1800_p1 = scmp.lt.s32.totalorder %s31_s19, %s31_s19 }
   0x5   :  { %p1796_p0 = scmp.ne.s32.totalorder %s31_s19, %s1795_s22  ;;  %p1801_p2 = scmp.lt.s32.totalorder %s1795_s22, %s1795_s22 }
   0x7   :  { %p1802_p3 = por %p1801_p2, %p1800_p1 }
   0x9   :  { %p1803_p4 = pnand %p1802_p3, %p1796_p0 }
   0xb   :  { %1806 = shalt.err (!%p1803_p4)
}
   0xc   :  { %s1875_s23 = smov 128   ;;  %s1876_s24 = smov 8  }
   0xd   :  { %36 = dma.hbm_to_vmem [thread:$0]  %s2274_s1, 4096, %s31_s19, [#allocation6], %s1875_s23, %s1875_s23, %s1876_s24  }
   0xe   :  { %s1815_s27 = scalar_lea.vmem %s19_s21, 3840  ;;  %p1820_p6 = scmp.lt.s32.totalorder %s19_s21, %s19_s21 }
   0xf   :  { %p1816_p5 = scmp.ne.s32.totalorder %s19_s21, %s1815_s27  ;;  %p1821_p7 = scmp.lt.s32.totalorder %s1815_s27, %s1815_s27 }
  0x11   :  { %p1822_p8 = por %p1821_p7, %p1820_p6 }
  0x13   :  { %p1823_p9 = pnand %p1822_p8, %p1816_p5 }
  0x15   :  { %1826 = shalt.err (!%p1823_p9)
}
  0x16   :  { %24 = dma.hbm_to_vmem [thread:$0]  %s2273_s0, 3840, %s19_s21, [#allocation3], %s1875_s23, %s1875_s23, %s1876_s24  }
  0x17   :  { %s1877_s30 = smov [#allocation7]  }
  0x18   :  { %s44_s6 = sshll.u32 %s1877_s30, 4  ;;  %s45_s6 = int_to_ptr.vmem [resolvable:$true] %s44_s6 }
  0x19   :  { %s1835_s7 = scalar_lea.vmem %s45_s6, 4096  ;;  %p1840_p11 = scmp.lt.s32.totalorder %s45_s6, %s45_s6 }
  0x1a   :  { %p1836_p10 = scmp.ne.s32.totalorder %s45_s6, %s1835_s7  ;;  %p1841_p12 = scmp.lt.s32.totalorder %s1835_s7, %s1835_s7 }
  0x1c   :  { %p1842_p13 = por %p1841_p12, %p1840_p11 }
  0x1e   :  { %p1843_p0 = pnand %p1842_p13, %p1836_p10 }
  0x20   :  { %1846 = shalt.err (!%p1843_p0)
}
  0x21   :  { %50 = dma.hbm_to_vmem [thread:$0]  %s2276_s3, 4096, %s45_s6, [#allocation6], %s1875_s23, %s1875_s23, %s1876_s24  }
  0x22   :  { %1867 = dma.done.wait [#allocation3], 3840  }
  0x23   :  { %1868 = vsyncadd [#allocation3], 4294963456 }
  0x24   :  { %1869 = dma.done.wait [#allocation6], 8192  }
  0x25   :  { %1870 = vsyncadd [#allocation6], 4294959104  ;;  %v1526_v0 = vld [vmem:[#allocation5 + $0x74] ss:$8 sps:$4 sm:$0xff]   ;;  %v1528_v1 = vld [vmem:[#allocation5 + $0x70] ss:$8 sps:$4 sm:$0xff]  }
  0x26   :  { %446 = vmatprep.subr.bf16.mxu0 %v1526_v0  ;;  %v1529_v2 = vld [vmem:[#allocation5 + $0x64] ss:$8 sps:$4 sm:$0xff]   ;;  %v1531_v3 = vld [vmem:[#allocation5 + $0x60] ss:$8 sps:$4 sm:$0xff]   ;;  %v1532_v4 = vld [vmem:[#allocation5 + $0x54] ss:$8 sps:$4 sm:$0xff]  }
  0x27   :  { %447 = vmatpush1.bf16.msra.mxu0 %v1528_v1  ;;  %v1534_v5 = vld [vmem:[#allocation5 + $0x50] ss:$8 sps:$4 sm:$0xff]   ;;  %v1535_v6 = vld [vmem:[#allocation5 + $0x44] ss:$8 sps:$4 sm:$0xff]   ;;  %v1537_v7 = vld [vmem:[#allocation5 + $0x40] ss:$8 sps:$4 sm:$0xff]  }
  0x28   :  { %448 = vmatprep.subr.bf16.mxu0 %v1529_v2  ;;  %v1538_v8 = vld [vmem:[#allocation5 + $0x34] ss:$8 sps:$4 sm:$0xff]   ;;  %v1540_v9 = vld [vmem:[#allocation5 + $0x30] ss:$8 sps:$4 sm:$0xff]   ;;  %v1541_v10 = vld [vmem:[#allocation5 + $0x24] ss:$8 sps:$4 sm:$0xff]  }
  0x29   :  { %v1543_v11 = vld [vmem:[#allocation5 + $0x20] ss:$8 sps:$4 sm:$0xff]   ;;  %v1544_v12 = vld [vmem:[#allocation5 + $0x14] ss:$8 sps:$4 sm:$0xff]   ;;  %v1546_v14 = vld [vmem:[#allocation5 + $0x10] ss:$8 sps:$4 sm:$0xff]  }
  0x2a   :  { %v1576_v13 = vld [vmem:[#allocation2 + $0x4] ss:$8 sps:$4 sm:$0xff]   ;;  %v1547_v15 = vld [vmem:[#allocation5 + $0x4] ss:$8 sps:$4 sm:$0xff]   ;;  %v1549_v16 = vld [vmem:[#allocation5] ss:$8 sps:$4 sm:$0xff]  }
  0x2b   :  { %449 = vmatpush1.bf16.msra.mxu0 %v1531_v3  ;;  %478 = vmatprep.mubr.bf16.mxu0 %v1576_v13  ;;  %v1550_v17 = vld [vmem:[#allocation5 + $0xf4] ss:$8 sps:$4 sm:$0xff]   ;;  %v1552_v18 = vld [vmem:[#allocation5 + $0xf0] ss:$8 sps:$4 sm:$0xff]   ;;  %v1553_v19 = vld [vmem:[#allocation5 + $0xe4] ss:$8 sps:$4 sm:$0xff]  }
  0x2c   :  { %450 = vmatprep.subr.bf16.mxu0 %v1532_v4  ;;  %v1555_v20 = vld [vmem:[#allocation5 + $0xe0] ss:$8 sps:$4 sm:$0xff]   ;;  %v1556_v21 = vld [vmem:[#allocation5 + $0xd4] ss:$8 sps:$4 sm:$0xff]   ;;  %v1558_v22 = vld [vmem:[#allocation5 + $0xd0] ss:$8 sps:$4 sm:$0xff]  }
  0x2d   :  { %v1559_v23 = vld [vmem:[#allocation5 + $0xc4] ss:$8 sps:$4 sm:$0xff]   ;;  %v1561_v24 = vld [vmem:[#allocation5 + $0xc0] ss:$8 sps:$4 sm:$0xff]   ;;  %v1562_v25 = vld [vmem:[#allocation5 + $0xb4] ss:$8 sps:$4 sm:$0xff]  }
  0x2e   :  { %v1564_v26 = vld [vmem:[#allocation5 + $0xb0] ss:$8 sps:$4 sm:$0xff]   ;;  %v1565_v27 = vld [vmem:[#allocation5 + $0xa4] ss:$8 sps:$4 sm:$0xff]   ;;  %v1619_v28 = vld [vmem:[#allocation7 + $0x74] ss:$8 sps:$4 sm:$0xff]  }
  0x2f   :  { %451 = vmatpush1.bf16.msra.mxu0 %v1534_v5  ;;  %v1621_v29 = vld [vmem:[#allocation7 + $0x70] ss:$8 sps:$4 sm:$0xff]   ;;  %v1622_v30 = vld [vmem:[#allocation7 + $0x64] ss:$8 sps:$4 sm:$0xff]   ;;  %v1567_v31 = vld [vmem:[#allocation5 + $0xa0] ss:$8 sps:$4 sm:$0xff]   ;;  %1163 = vmatprep.subr.bf16.mxu1 %v1619_v28 }
  0x30   :  { %452 = vmatprep.subr.bf16.mxu0 %v1535_v6  ;;  %v1568_v32 = vld [vmem:[#allocation5 + $0x94] ss:$8 sps:$4 sm:$0xff]   ;;  %1164 = vmatpush1.bf16.msra.mxu1 %v1621_v29  ;;  %v1624_v33 = vld [vmem:[#allocation7 + $0x60] ss:$8 sps:$4 sm:$0xff]   ;;  %v1570_v35 = vld [vmem:[#allocation5 + $0x90] ss:$8 sps:$4 sm:$0xff]  }
  0x31   :  { %1165 = vmatprep.subr.bf16.mxu1 %v1622_v30  ;;  %v1625_v34 = vld [vmem:[#allocation7 + $0x54] ss:$8 sps:$4 sm:$0xff]   ;;  %v1571_v36 = vld [vmem:[#allocation5 + $0x84] ss:$8 sps:$4 sm:$0xff]   ;;  %v1627_v37 = vld [vmem:[#allocation7 + $0x50] ss:$8 sps:$4 sm:$0xff]   ;;  %v126_v30 = vlaneseq }
  0x32   :  { %v1628_v38 = vld [vmem:[#allocation7 + $0x44] ss:$8 sps:$4 sm:$0xff]   ;;  %v1573_v39 = vld [vmem:[#allocation5 + $0x80] ss:$8 sps:$4 sm:$0xff]   ;;  %v1574_v41 = vld [vmem:[#allocation2] ss:$8 sps:$4 sm:$0xff]  }
  0x33   :  { %453 = vmatpush1.bf16.msra.mxu0 %v1537_v7  ;;  %v1630_v40 = vld [vmem:[#allocation7 + $0x40] ss:$8 sps:$4 sm:$0xff]   ;;  %v1631_v42 = vld [vmem:[#allocation7 + $0x34] ss:$8 sps:$4 sm:$0xff]   ;;  %v1577_v43 = vld [vmem:[#allocation2 + $0x14] ss:$8 sps:$4 sm:$0xff]  }
  0x34   :  { %454 = vmatprep.subr.bf16.mxu0 %v1538_v8  ;;  %1166 = vmatpush1.bf16.msra.mxu1 %v1624_v33  ;;  %v1633_v44 = vld [vmem:[#allocation7 + $0x30] ss:$8 sps:$4 sm:$0xff]   ;;  %v1634_v45 = vld [vmem:[#allocation7 + $0x24] ss:$8 sps:$4 sm:$0xff]   ;;  %v1636_v46 = vld [vmem:[#allocation7 + $0x20] ss:$8 sps:$4 sm:$0xff]  }
  0x35   :  { %1167 = vmatprep.subr.bf16.mxu1 %v1625_v34  ;;  %v1579_v47 = vld [vmem:[#allocation2 + $0x10] ss:$8 sps:$4 sm:$0xff]   ;;  %v1637_v48 = vld [vmem:[#allocation7 + $0x14] ss:$8 sps:$4 sm:$0xff]   ;;  %v1639_v50 = vld [vmem:[#allocation7 + $0x10] ss:$8 sps:$4 sm:$0xff]  }
  0x36   :  { %v1580_v49 = vld [vmem:[#allocation2 + $0x24] ss:$8 sps:$4 sm:$0xff]   ;;  %v1640_v51 = vld [vmem:[#allocation7 + $0x4] ss:$8 sps:$4 sm:$0xff]   ;;  %v1642_v52 = vld [vmem:[#allocation7] ss:$8 sps:$4 sm:$0xff]  }
  0x37   :  { %455 = vmatpush1.bf16.msra.mxu0 %v1540_v9  ;;  %v1582_v53 = vld [vmem:[#allocation2 + $0x20] ss:$8 sps:$4 sm:$0xff]   ;;  %v1583_v54 = vld [vmem:[#allocation2 + $0x34] ss:$8 sps:$4 sm:$0xff]   ;;  %v1585_v55 = vld [vmem:[#allocation2 + $0x30] ss:$8 sps:$4 sm:$0xff]  }
  0x38   :  { %456 = vmatprep.subr.bf16.mxu0 %v1541_v10  ;;  %1168 = vmatpush1.bf16.msra.mxu1 %v1627_v37  ;;  %v1586_v56 = vld [vmem:[#allocation2 + $0x44] ss:$8 sps:$4 sm:$0xff]   ;;  %v1588_v57 = vld [vmem:[#allocation2 + $0x40] ss:$8 sps:$4 sm:$0xff]   ;;  %v1589_v58 = vld [vmem:[#allocation2 + $0x54] ss:$8 sps:$4 sm:$0xff]  }
  0x39   :  { %1169 = vmatprep.subr.bf16.mxu1 %v1628_v38  ;;  %v1591_v59 = vld [vmem:[#allocation2 + $0x50] ss:$8 sps:$4 sm:$0xff]   ;;  %v1592_v60 = vld [vmem:[#allocation2 + $0x64] ss:$8 sps:$4 sm:$0xff]   ;;  %v1594_v61 = vld [vmem:[#allocation2 + $0x60] ss:$8 sps:$4 sm:$0xff]  }
  0x3a   :  { %v1595_v62 = vld [vmem:[#allocation2 + $0x74] ss:$8 sps:$4 sm:$0xff]   ;;  %v1597_v63 = vld [vmem:[#allocation2 + $0x70] ss:$8 sps:$4 sm:$0xff]   ;;  %v1598_v0 = vld [vmem:[#allocation2 + $0x84] ss:$8 sps:$4 sm:$0xff]  }
  0x3b   :  { %457 = vmatpush1.bf16.msra.mxu0 %v1543_v11  ;;  %v1600_v1 = vld [vmem:[#allocation2 + $0x80] ss:$8 sps:$4 sm:$0xff]   ;;  %v1601_v2 = vld [vmem:[#allocation2 + $0x94] ss:$8 sps:$4 sm:$0xff]   ;;  %v1643_v3 = vld [vmem:[#allocation7 + $0xf4] ss:$8 sps:$4 sm:$0xff]  }
  0x3c   :  { %458 = vmatprep.subr.bf16.mxu0 %v1544_v12  ;;  %1170 = vmatpush1.bf16.msra.mxu1 %v1630_v40  ;;  %v1645_v4 = vld [vmem:[#allocation7 + $0xf0] ss:$8 sps:$4 sm:$0xff]   ;;  %v1646_v5 = vld [vmem:[#allocation7 + $0xe4] ss:$8 sps:$4 sm:$0xff]   ;;  %v1648_v6 = vld [vmem:[#allocation7 + $0xe0] ss:$8 sps:$4 sm:$0xff]  }
  0x3d   :  { %1171 = vmatprep.subr.bf16.mxu1 %v1631_v42  ;;  %v1603_v7 = vld [vmem:[#allocation2 + $0x90] ss:$8 sps:$4 sm:$0xff]   ;;  %v1604_v8 = vld [vmem:[#allocation2 + $0xa4] ss:$8 sps:$4 sm:$0xff]   ;;  %v1651_v10 = vld [vmem:[#allocation7 + $0xd0] ss:$8 sps:$4 sm:$0xff]  }
  0x3e   :  { %v1649_v9 = vld [vmem:[#allocation7 + $0xd4] ss:$8 sps:$4 sm:$0xff]   ;;  %v1652_v11 = vld [vmem:[#allocation7 + $0xc4] ss:$8 sps:$4 sm:$0xff]   ;;  %v1654_v12 = vld [vmem:[#allocation7 + $0xc0] ss:$8 sps:$4 sm:$0xff]  }
  0x3f   :  { %459 = vmatpush1.bf16.msra.mxu0 %v1546_v14  ;;  %v1606_v13 = vld [vmem:[#allocation2 + $0xa0] ss:$8 sps:$4 sm:$0xff]   ;;  %v1607_v14 = vld [vmem:[#allocation2 + $0xb4] ss:$8 sps:$4 sm:$0xff]   ;;  %v1616_v28 = vld [vmem:[#allocation2 + $0xe4] ss:$8 sps:$4 sm:$0xff]  }
  0x40   :  { %460 = vmatprep.subr.bf16.mxu0 %v1547_v15  ;;  %1172 = vmatpush1.bf16.msra.mxu1 %v1633_v44  ;;  %v1655_v15 = vld [vmem:[#allocation7 + $0xb4] ss:$8 sps:$4 sm:$0xff]   ;;  %v1618_v29 = vld [vmem:[#allocation2 + $0xe0] ss:$8 sps:$4 sm:$0xff]  }
  0x41   :  { %1173 = vmatprep.subr.bf16.mxu1 %v1634_v45  ;;  %v124_v33 = vld [vmem:[%s2275_s2] sm:$0x3] }
  0x43   :  { %461 = vmatpush1.bf16.msra.mxu0 %v1549_v16  ;;  %v1657_v16 = vld [vmem:[#allocation7 + $0xb0] ss:$8 sps:$4 sm:$0xff]  }
  0x44   :  { %462 = vmatprep.subr.bf16.mxu0 %v1550_v17  ;;  %1174 = vmatpush1.bf16.msra.mxu1 %v1636_v46  ;;  %v1658_v17 = vld [vmem:[#allocation7 + $0xa4] ss:$8 sps:$4 sm:$0xff]  }
  0x45   :  { %1175 = vmatprep.subr.bf16.mxu1 %v1637_v48 }
  0x47   :  { %463 = vmatpush2.bf16.msra.mxu0 %v1552_v18  ;;  %v1609_v18 = vld [vmem:[#allocation2 + $0xb0] ss:$8 sps:$4 sm:$0xff]  }
  0x48   :  { %464 = vmatprep.subr.bf16.mxu0 %v1553_v19  ;;  %1176 = vmatpush1.bf16.msra.mxu1 %v1639_v50  ;;  %v1660_v19 = vld [vmem:[#allocation7 + $0xa0] ss:$8 sps:$4 sm:$0xff]  }
  0x49   :  { %1177 = vmatprep.subr.bf16.mxu1 %v1640_v51 }
  0x4b   :  { %465 = vmatpush2.bf16.msra.mxu0 %v1555_v20  ;;  %v1610_v20 = vld [vmem:[#allocation2 + $0xc4] ss:$8 sps:$4 sm:$0xff]  }
  0x4c   :  { %466 = vmatprep.subr.bf16.mxu0 %v1556_v21  ;;  %1178 = vmatpush1.bf16.msra.mxu1 %v1642_v52  ;;  %v1661_v21 = vld [vmem:[#allocation7 + $0x94] ss:$8 sps:$4 sm:$0xff]  }
  0x4d   :  { %1179 = vmatprep.subr.bf16.mxu1 %v1643_v3 }
  0x4f   :  { %467 = vmatpush2.bf16.msra.mxu0 %v1558_v22  ;;  %v1663_v22 = vld [vmem:[#allocation7 + $0x90] ss:$8 sps:$4 sm:$0xff]  }
  0x50   :  { %468 = vmatprep.subr.bf16.mxu0 %v1559_v23  ;;  %1180 = vmatpush2.bf16.msra.mxu1 %v1645_v4  ;;  %v1664_v23 = vld [vmem:[#allocation7 + $0x84] ss:$8 sps:$4 sm:$0xff]  }
  0x51   :  { %1181 = vmatprep.subr.bf16.mxu1 %v1646_v5 }
  0x53   :  { %469 = vmatpush2.bf16.msra.mxu0 %v1561_v24  ;;  %v1612_v24 = vld [vmem:[#allocation2 + $0xc0] ss:$8 sps:$4 sm:$0xff]  }
  0x54   :  { %470 = vmatprep.subr.bf16.mxu0 %v1562_v25  ;;  %1182 = vmatpush2.bf16.msra.mxu1 %v1648_v6  ;;  %v1666_v25 = vld [vmem:[#allocation7 + $0x80] ss:$8 sps:$4 sm:$0xff]  }
  0x55   :  { %1183 = vmatprep.subr.bf16.mxu1 %v1649_v9 }
  0x57   :  { %471 = vmatpush2.bf16.msra.mxu0 %v1564_v26  ;;  %v1613_v26 = vld [vmem:[#allocation2 + $0xd4] ss:$8 sps:$4 sm:$0xff]  }
  0x58   :  { %472 = vmatprep.subr.bf16.mxu0 %v1565_v27  ;;  %1184 = vmatpush2.bf16.msra.mxu1 %v1651_v10  ;;  %v1615_v27 = vld [vmem:[#allocation2 + $0xd0] ss:$8 sps:$4 sm:$0xff]  }
  0x59   :  { %1185 = vmatprep.subr.bf16.mxu1 %v1652_v11 }
  0x5b   :  { %473 = vmatpush2.bf16.msra.mxu0 %v1567_v31  ;;  %v1920_v31 = vshrl.u32 %v126_v30, 7 }
  0x5c   :  { %474 = vmatprep.subr.bf16.mxu0 %v1568_v32  ;;  %1186 = vmatpush2.bf16.msra.mxu1 %v1654_v12 }
  0x5d   :  { %1187 = vmatprep.subr.bf16.mxu1 %v1655_v15  ;;  %v128_v32 = vsub.s32 0, %v1920_v31  ;;  %v132_v34 = vsub.s32 1, %v1920_v31 }
  0x5f   :  { %475 = vmatpush2.bf16.msra.mxu0 %v1570_v35  ;;  %v1929_v35 = vrot.slane %v124_v33, %v128_v32 }
  0x60   :  { %476 = vmatprep.subr.bf16.mxu0 %v1571_v36  ;;  %1188 = vmatpush2.bf16.msra.mxu1 %v1657_v16  ;;  %v1933_v36 = vrot.slane %v124_v33, %v132_v34 }
  0x61   :  { %1189 = vmatprep.subr.bf16.mxu1 %v1658_v17 }
  0x63   :  { %477 = vmatpush2.bf16.msra.mxu0 %v1573_v39 }
  0x64   :  { %1190 = vmatpush2.bf16.msra.mxu1 %v1660_v19 }
  0x65   :  { %1191 = vmatprep.subr.bf16.mxu1 %v1661_v21 }
  0x66   :  { %479 = vmatmul.mubr.bf16.vlgmr.msra.gmra.mxu0 %v1574_v41 }
  0x67   :  { %488 = vmatprep.mubr.bf16.mxu0 %v1577_v43 }
  0x68   :  { %1192 = vmatpush2.bf16.msra.mxu1 %v1663_v22 }
  0x69   :  { %1193 = vmatprep.subr.bf16.mxu1 %v1664_v23 }
  0x6c   :  { %1194 = vmatpush2.bf16.msra.mxu1 %v1666_v25 }
  0x6e   :  { %489 = vmatmul.mubr.bf16.gmra.mxu0 %v1579_v47 }
  0x6f   :  { %498 = vmatprep.mubr.bf16.mxu0 %v1580_v49 }
  0x76   :  { %499 = vmatmul.mubr.bf16.gmra.mxu0 %v1582_v53 }
  0x77   :  { %508 = vmatprep.mubr.bf16.mxu0 %v1583_v54 }
  0x7e   :  { %509 = vmatmul.mubr.bf16.gmra.mxu0 %v1585_v55 }
  0x7f   :  { %518 = vmatprep.mubr.bf16.mxu0 %v1586_v56 }
  0x86   :  { %519 = vmatmul.mubr.bf16.gmra.mxu0 %v1588_v57 }
  0x87   :  { %528 = vmatprep.mubr.bf16.mxu0 %v1589_v58 }
  0x8e   :  { %529 = vmatmul.mubr.bf16.gmra.mxu0 %v1591_v59 }
  0x8f   :  { %538 = vmatprep.mubr.bf16.mxu0 %v1592_v60 }
  0x96   :  { %539 = vmatmul.mubr.bf16.gmra.mxu0 %v1594_v61 }
  0x97   :  { %548 = vmatprep.mubr.bf16.mxu0 %v1595_v62 }
  0x9e   :  { %549 = vmatmul.mubr.bf16.gmra.mxu0 %v1597_v63 }
  0x9f   :  { %558 = vmatprep.mubr.bf16.mxu0 %v1598_v0 }
  0xa6   :  { %559 = vmatmul.mubr.bf16.gmra.mxu0 %v1600_v1 }
  0xa7   :  { %568 = vmatprep.mubr.bf16.mxu0 %v1601_v2 }
  0xae   :  { %569 = vmatmul.mubr.bf16.gmra.mxu0 %v1603_v7 }
  0xaf   :  { %578 = vmatprep.mubr.bf16.mxu0 %v1604_v8 }
  0xb6   :  { %579 = vmatmul.mubr.bf16.gmra.mxu0 %v1606_v13 }
  0xb7   :  { %588 = vmatprep.mubr.bf16.mxu0 %v1607_v14 }
  0xbe   :  { %589 = vmatmul.mubr.bf16.gmra.mxu0 %v1609_v18 }
  0xbf   :  { %598 = vmatprep.mubr.bf16.mxu0 %v1610_v20 }
  0xc6   :  { %599 = vmatmul.mubr.bf16.gmra.mxu0 %v1612_v24 }
  0xc7   :  { %608 = vmatprep.mubr.bf16.mxu0 %v1613_v26 }
  0xce   :  { %609 = vmatmul.mubr.bf16.gmra.mxu0 %v1615_v27 }
  0xcf   :  { %618 = vmatprep.mubr.bf16.mxu0 %v1616_v28 }
  0xd6   :  { %619 = vmatmul.mubr.bf16.gmra.mxu0 %v1618_v29 }
 0x126   :  { %v480_v37 = vpop.f32.mrf.mxu0 }
 0x127   :  { %v481_v38 = vadd.f32 %v480_v37, %v1929_v35 }
 0x128   :  { %v482_v39 = vpop.f32.mrf.mxu0 }
 0x129   :  { %v689_v40 = vmul.f32 0.70710677, %v481_v38  ;;  %v483_v41 = vadd.f32 %v482_v39, %v1933_v36  ;;  %v629_v23 = vmul.f32 0.5, %v481_v38 }
 0x12a   :  { %v484_v42 = vpop.f32.mrf.mxu0 }
 0x12b   :  { %v690_v43 = vmul.f32 0.70710677, %v483_v41  ;;  %v485_v44 = vadd.f32 %v484_v42, %v1929_v35  ;;  %1667 = verf.f32 %v689_v40  ;;  %v630_v18 = vmul.f32 0.5, %v483_v41 }
 0x12c   :  { %v486_v45 = vpop.f32.mrf.mxu0 }
 0x12d   :  { %v691_v46 = vmul.f32 0.70710677, %v485_v44  ;;  %v487_v47 = vadd.f32 %v486_v45, %v1933_v36  ;;  %1669 = verf.f32 %v690_v43  ;;  %v631_v16 = vmul.f32 0.5, %v485_v44 }
 0x12e   :  { %v490_v48 = vpop.f32.mrf.mxu0 }
 0x12f   :  { %1671 = verf.f32 %v691_v46  ;;  %v692_v49 = vmul.f32 0.70710677, %v487_v47  ;;  %v1940_v50 = vadd.f32 %v490_v48, %v1929_v35  ;;  %v632_v19 = vmul.f32 0.5, %v487_v47 }
 0x130   :  { %v492_v51 = vpop.f32.mrf.mxu0 }
 0x131   :  { %1673 = verf.f32 %v692_v49  ;;  %v693_v52 = vmul.f32 0.70710677, %v1940_v50  ;;  %v1944_v53 = vadd.f32 %v492_v51, %v1933_v36 }
 0x132   :  { %v494_v54 = vpop.f32.mrf.mxu0 }
 0x133   :  { %v694_v55 = vmul.f32 0.70710677, %v1944_v53  ;;  %v495_v56 = vadd.f32 %v494_v54, %v1929_v35  ;;  %1675 = verf.f32 %v693_v52 }
 0x134   :  { %v496_v57 = vpop.f32.mrf.mxu0 }
 0x135   :  { %v695_v58 = vmul.f32 0.70710677, %v495_v56  ;;  %v497_v59 = vadd.f32 %v496_v57, %v1933_v36  ;;  %1677 = verf.f32 %v694_v55  ;;  %v635_v48 = vmul.f32 0.5, %v495_v56 }
 0x136   :  { %v500_v60 = vpop.f32.mrf.mxu0 }
 0x137   :  { %1679 = verf.f32 %v695_v58  ;;  %v696_v61 = vmul.f32 0.70710677, %v497_v59  ;;  %v1950_v62 = vadd.f32 %v500_v60, %v1929_v35  ;;  %v636_v49 = vmul.f32 0.5, %v497_v59 }
 0x138   :  { %v502_v63 = vpop.f32.mrf.mxu0  ;;  %v1668_v1 = vpop.eup %1667  ;;  %v633_v58 = vmul.f32 0.5, %v1940_v50  ;;  %v634_v60 = vmul.f32 0.5, %v1944_v53 }
 0x139   :  { %1681 = verf.f32 %v696_v61  ;;  %v697_v0 = vmul.f32 0.70710677, %v1950_v62  ;;  %v1954_v2 = vadd.f32 %v502_v63, %v1933_v36  ;;  %v809_v15 = vadd.f32 1.0, %v1668_v1 }
 0x13a   :  { %v504_v3 = vpop.f32.mrf.mxu0  ;;  %v1670_v4 = vpop.eup %1669 }
 0x13b   :  { %v1957_v5 = vadd.f32 %v504_v3, %v1929_v35  ;;  %v698_v7 = vmul.f32 0.70710677, %v1954_v2  ;;  %1683 = verf.f32 %v697_v0  ;;  %v810_v14 = vadd.f32 1.0, %v1670_v4 }
 0x13c   :  { %v1672_v6 = vpop.eup %1671  ;;  %v506_v8 = vpop.f32.mrf.mxu0  ;;  %v869_v33 = vmul.f32 %v809_v15, %v629_v23 }
 0x13d   :  { %v811_v9 = vadd.f32 1.0, %v1672_v6  ;;  %v699_v10 = vmul.f32 0.70710677, %v1957_v5  ;;  %v1962_v11 = vadd.f32 %v506_v8, %v1933_v36  ;;  %1685 = verf.f32 %v698_v7 }
 0x13e   :  { %v1674_v12 = vpop.eup %1673  ;;  %v510_v13 = vpop.f32.mrf.mxu0  ;;  %v870_v28 = vmul.f32 %v810_v14, %v630_v18 }
 0x13f   :  { %1687 = verf.f32 %v699_v10  ;;  %v700_v17 = vmul.f32 0.70710677, %v1962_v11  ;;  %v1966_v20 = vadd.f32 %v510_v13, %v1929_v35  ;;  %v812_v22 = vadd.f32 1.0, %v1674_v12 }
 0x140   :  { %v512_v21 = vpop.f32.mrf.mxu0  ;;  %v871_v24 = vmul.f32 %v811_v9, %v631_v16  ;;  %v1676_v26 = vpop.eup %1675  ;;  %v639_v10 = vmul.f32 0.5, %v1957_v5 }
 0x141   :  { %1689 = verf.f32 %v700_v17  ;;  %v1969_v25 = vadd.f32 %v512_v21, %v1933_v36  ;;  %v872_v29 = vmul.f32 %v812_v22, %v632_v19  ;;  %v701_v37 = vmul.f32 0.70710677, %v1966_v20 }
 0x142   :  { %v514_v27 = vpop.f32.mrf.mxu0  ;;  %v1678_v30 = vpop.eup %1677  ;;  %v929_v45 = vpack.c.bf16 %v871_v24, %v869_v33  ;;  %v813_v54 = vadd.f32 1.0, %v1676_v26  ;;  %v640_v19 = vmul.f32 0.5, %v1962_v11  ;;  %v638_v26 = vmul.f32 0.5, %v1954_v2 }
 0x143   :  { %v702_v39 = vmul.f32 0.70710677, %v1969_v25  ;;  %v1974_v41 = vadd.f32 %v514_v27, %v1929_v35  ;;  %v930_v42 = vpack.c.bf16 %v872_v29, %v870_v28  ;;  %v814_v47 = vadd.f32 1.0, %v1678_v30 }
 0x144   :  { %v1680_v40 = vpop.eup %1679  ;;  %v516_v38 = vpop.f32.mrf.mxu0  ;;  %v873_v50 = vmul.f32 %v813_v54, %v633_v58  ;;  %v637_v11 = vmul.f32 0.5, %v1950_v62 }
 0x145   :  { %v815_v43 = vadd.f32 1.0, %v1680_v40  ;;  %1691 = verf.f32 %v702_v39  ;;  %v1977_v44 = vadd.f32 %v516_v38, %v1933_v36  ;;  %v703_v51 = vmul.f32 0.70710677, %v1974_v41  ;;  %1195 = vmatprep.mubr.bf16.mxu1 %v930_v42 }
 0x146   :  { %v1682_v46 = vpop.eup %1681  ;;  %v520_v52 = vpop.f32.mrf.mxu0  ;;  %1693 = verf.f32 %v701_v37  ;;  %1196 = vmatmul.mubr.bf16.vlgmr.msra.gmra.mxu1 %v929_v45  ;;  %v874_v3 = vmul.f32 %v814_v47, %v634_v60  ;;  %v642_v45 = vmul.f32 0.5, %v1969_v25 }
 0x147   :  { %v816_v55 = vadd.f32 1.0, %v1682_v46  ;;  %v704_v57 = vmul.f32 0.70710677, %v1977_v44  ;;  %1695 = verf.f32 %v703_v51  ;;  %v1984_v61 = vadd.f32 %v520_v52, %v1929_v35 }
 0x148   :  { %v522_v56 = vpop.f32.mrf.mxu0  ;;  %v875_v59 = vmul.f32 %v815_v43, %v635_v48  ;;  %v1684_v1 = vpop.eup %1683  ;;  %v643_v51 = vmul.f32 0.5, %v1974_v41  ;;  %v644_v58 = vmul.f32 0.5, %v1977_v44 }
 0x149   :  { %v876_v63 = vmul.f32 %v816_v55, %v636_v49  ;;  %1697 = verf.f32 %v704_v57  ;;  %v1987_v0 = vadd.f32 %v522_v56, %v1933_v36  ;;  %v705_v4 = vmul.f32 0.70710677, %v1984_v61 }
 0x14a   :  { %v524_v6 = vpop.f32.mrf.mxu0  ;;  %v1686_v7 = vpop.eup %1685  ;;  %v931_v16 = vpack.c.bf16 %v875_v59, %v873_v50  ;;  %v817_v23 = vadd.f32 1.0, %v1684_v1  ;;  %v641_v1 = vmul.f32 0.5, %v1966_v20 }
 0x14b   :  { %v706_v53 = vmul.f32 0.70710677, %v1987_v0  ;;  %v1992_v8 = vadd.f32 %v524_v6, %v1929_v35  ;;  %v932_v13 = vpack.c.bf16 %v876_v63, %v874_v3  ;;  %1699 = verf.f32 %v705_v4 }
 0x14c   :  { %v1688_v9 = vpop.eup %1687  ;;  %v526_v12 = vpop.f32.mrf.mxu0  ;;  %v818_v18 = vadd.f32 1.0, %v1686_v7  ;;  %v877_v42 = vmul.f32 %v817_v23, %v637_v11 }
 0x14d   :  { %v819_v14 = vadd.f32 1.0, %v1688_v9  ;;  %v707_v15 = vmul.f32 0.70710677, %v1992_v8  ;;  %1701 = verf.f32 %v706_v53  ;;  %v1998_v21 = vadd.f32 %v526_v12, %v1933_v36  ;;  %1205 = vmatprep.mubr.bf16.mxu1 %v932_v13 }
 0x14e   :  { %v1690_v17 = vpop.eup %1689  ;;  %v530_v22 = vpop.f32.mrf.mxu0  ;;  %1206 = vmatmul.mubr.bf16.gmra.mxu1 %v931_v16  ;;  %v878_v39 = vmul.f32 %v818_v18, %v638_v26 }
 0x14f   :  { %v820_v24 = vadd.f32 1.0, %v1690_v17  ;;  %1703 = verf.f32 %v707_v15  ;;  %v2001_v5 = vadd.f32 %v530_v22, %v1929_v35  ;;  %v708_v27 = vmul.f32 0.70710677, %v1998_v21 }
 0x150   :  { %v532_v28 = vpop.f32.mrf.mxu0  ;;  %v879_v29 = vmul.f32 %v819_v14, %v639_v10 }
 0x151   :  { %v880_v30 = vmul.f32 %v820_v24, %v640_v19  ;;  %v2007_v33 = vadd.f32 %v532_v28, %v1933_v36  ;;  %1705 = verf.f32 %v708_v27  ;;  %v709_v40 = vmul.f32 0.70710677, %v2001_v5 }
 0x152   :  { %v1692_v37 = vpop.eup %1691  ;;  %v534_v38 = vpop.f32.mrf.mxu0  ;;  %v933_v54 = vpack.c.bf16 %v879_v29, %v877_v42  ;;  %v647_v28 = vmul.f32 0.5, %v1992_v8  ;;  %v646_v29 = vmul.f32 0.5, %v1987_v0 }
 0x153   :  { %v710_v43 = vmul.f32 0.70710677, %v2007_v33  ;;  %v1694_v2 = vpop.eup %1693  ;;  %v822_v46 = vadd.f32 1.0, %v1692_v37  ;;  %v2013_v62 = vadd.f32 %v534_v38, %v1929_v35  ;;  %v934_v48 = vpack.c.bf16 %v880_v30, %v878_v39 }
 0x154   :  { %v536_v47 = vpop.f32.mrf.mxu0  ;;  %v1696_v49 = vpop.eup %1695  ;;  %v821_v56 = vadd.f32 1.0, %v1694_v2  ;;  %v648_v30 = vmul.f32 0.5, %v1998_v21  ;;  %v645_v38 = vmul.f32 0.5, %v1984_v61  ;;  %v650_v0 = vmul.f32 0.5, %v2007_v33 }
 0x155   :  { %1707 = verf.f32 %v710_v43  ;;  %v2017_v52 = vadd.f32 %v536_v47, %v1933_v36  ;;  %v823_v57 = vadd.f32 1.0, %v1696_v49  ;;  %v711_v25 = vmul.f32 0.70710677, %v2013_v62  ;;  %1215 = vmatprep.mubr.bf16.mxu1 %v934_v48 }
 0x156   :  { %v1698_v55 = vpop.eup %1697  ;;  %1709 = verf.f32 %v709_v40  ;;  %v540_v60 = vpop.f32.mrf.mxu0  ;;  %1216 = vmatmul.mubr.bf16.gmra.mxu1 %v933_v54  ;;  %v882_v3 = vmul.f32 %v822_v46, %v642_v45  ;;  %v881_v12 = vmul.f32 %v821_v56, %v641_v1  ;;  %v651_v49 = vmul.f32 0.5, %v2013_v62 }
 0x157   :  { %v824_v59 = vadd.f32 1.0, %v1698_v55  ;;  %v712_v63 = vmul.f32 0.70710677, %v2017_v52  ;;  %v2023_v41 = vadd.f32 %v540_v60, %v1929_v35  ;;  %1711 = verf.f32 %v711_v25 }
 0x158   :  { %v542_v4 = vpop.f32.mrf.mxu0  ;;  %v883_v6 = vmul.f32 %v823_v57, %v643_v51  ;;  %v1700_v50 = vpop.eup %1699  ;;  %v652_v25 = vmul.f32 0.5, %v2017_v52  ;;  %v649_v52 = vmul.f32 0.5, %v2001_v5 }
 0x159   :  { %v884_v44 = vmul.f32 %v824_v59, %v644_v58  ;;  %1713 = verf.f32 %v712_v63  ;;  %v713_v7 = vmul.f32 0.70710677, %v2023_v41  ;;  %v2028_v53 = vadd.f32 %v542_v4, %v1933_v36 }
 0x15a   :  { %v544_v9 = vpop.f32.mrf.mxu0  ;;  %v1702_v10 = vpop.eup %1701  ;;  %v935_v19 = vpack.c.bf16 %v883_v6, %v881_v12  ;;  %v825_v27 = vadd.f32 1.0, %v1700_v50 }
 0x15b   :  { %v2031_v13 = vadd.f32 %v544_v9, %v1929_v35  ;;  %v936_v14 = vpack.c.bf16 %v884_v44, %v882_v3  ;;  %v714_v15 = vmul.f32 0.70710677, %v2028_v53  ;;  %1715 = verf.f32 %v713_v7 }
 0x15c   :  { %v1704_v20 = vpop.eup %1703  ;;  %v546_v16 = vpop.f32.mrf.mxu0  ;;  %v826_v22 = vadd.f32 1.0, %v1702_v10  ;;  %v885_v48 = vmul.f32 %v825_v27, %v645_v38 }
 0x15d   :  { %v827_v17 = vadd.f32 1.0, %v1704_v20  ;;  %v715_v18 = vmul.f32 0.70710677, %v2031_v13  ;;  %1225 = vmatprep.mubr.bf16.mxu1 %v936_v14  ;;  %1717 = verf.f32 %v714_v15  ;;  %v2036_v23 = vadd.f32 %v546_v16, %v1933_v36 }
 0x15e   :  { %v550_v24 = vpop.f32.mrf.mxu0  ;;  %v1706_v26 = vpop.eup %1705  ;;  %1226 = vmatmul.mubr.bf16.gmra.mxu1 %v935_v19  ;;  %v886_v2 = vmul.f32 %v826_v22, %v646_v29 }
 0x15f   :  { %1719 = verf.f32 %v715_v18  ;;  %v2040_v11 = vadd.f32 %v550_v24, %v1929_v35  ;;  %v828_v37 = vadd.f32 1.0, %v1706_v26  ;;  %v716_v39 = vmul.f32 0.70710677, %v2036_v23 }
 0x160   :  { %v552_v40 = vpop.f32.mrf.mxu0  ;;  %v887_v42 = vmul.f32 %v827_v17, %v647_v28 }
 0x161   :  { %v2047_v43 = vadd.f32 %v552_v40, %v1933_v36  ;;  %v888_v45 = vmul.f32 %v828_v37, %v648_v30  ;;  %1721 = verf.f32 %v716_v39  ;;  %v717_v21 = vmul.f32 0.70710677, %v2040_v11 }
 0x162   :  { %v1708_v8 = vpop.eup %1707  ;;  %v554_v46 = vpop.f32.mrf.mxu0  ;;  %v937_v56 = vpack.c.bf16 %v887_v42, %v885_v48  ;;  %v655_v40 = vmul.f32 0.5, %v2031_v13  ;;  %v654_v42 = vmul.f32 0.5, %v2028_v53 }
 0x163   :  { %v1710_v47 = vpop.eup %1709  ;;  %v718_v51 = vmul.f32 0.70710677, %v2047_v43  ;;  %v2054_v61 = vadd.f32 %v554_v46, %v1929_v35  ;;  %v938_v55 = vpack.c.bf16 %v888_v45, %v886_v2  ;;  %v830_v58 = vadd.f32 1.0, %v1708_v8 }
 0x164   :  { %v556_v54 = vpop.f32.mrf.mxu0  ;;  %v1712_v57 = vpop.eup %1711  ;;  %v829_v59 = vadd.f32 1.0, %v1710_v47  ;;  %v656_v8 = vmul.f32 0.5, %v2036_v23  ;;  %v653_v47 = vmul.f32 0.5, %v2023_v41  ;;  %v658_v41 = vmul.f32 0.5, %v2047_v43 }
 0x165   :  { %v2058_v60 = vadd.f32 %v556_v54, %v1933_v36  ;;  %v831_v63 = vadd.f32 1.0, %v1712_v57  ;;  %1723 = verf.f32 %v718_v51  ;;  %v719_v62 = vmul.f32 0.70710677, %v2054_v61  ;;  %1235 = vmatprep.mubr.bf16.mxu1 %v938_v55 }
 0x166   :  { %v1714_v33 = vpop.eup %1713  ;;  %v560_v1 = vpop.f32.mrf.mxu0  ;;  %1725 = verf.f32 %v717_v21  ;;  %1236 = vmatmul.mubr.bf16.gmra.mxu1 %v937_v56  ;;  %v890_v50 = vmul.f32 %v830_v58, %v650_v0  ;;  %v889_v12 = vmul.f32 %v829_v59, %v649_v52 }
 0x167   :  { %v832_v3 = vadd.f32 1.0, %v1714_v33  ;;  %v720_v4 = vmul.f32 0.70710677, %v2058_v60  ;;  %v2063_v6 = vadd.f32 %v560_v1, %v1929_v35  ;;  %v891_v44 = vmul.f32 %v831_v63, %v651_v49 }
 0x168   :  { %1727 = verf.f32 %v719_v62  ;;  %v562_v7 = vpop.f32.mrf.mxu0  ;;  %v1716_v10 = vpop.eup %1715  ;;  %v660_v52 = vmul.f32 0.5, %v2058_v60 }
 0x169   :  { %v892_v9 = vmul.f32 %v832_v3, %v652_v25  ;;  %1729 = verf.f32 %v720_v4  ;;  %v721_v14 = vmul.f32 0.70710677, %v2063_v6  ;;  %v2068_v20 = vadd.f32 %v562_v7, %v1933_v36 }
 0x16a   :  { %v564_v15 = vpop.f32.mrf.mxu0  ;;  %v1718_v16 = vpop.eup %1717  ;;  %v939_v24 = vpack.c.bf16 %v891_v44, %v889_v12  ;;  %v833_v39 = vadd.f32 1.0, %v1716_v10  ;;  %v659_v3 = vmul.f32 0.5, %v2054_v61 }
 0x16b   :  { %v2071_v17 = vadd.f32 %v564_v15, %v1929_v35  ;;  %v940_v18 = vpack.c.bf16 %v892_v9, %v890_v50  ;;  %v722_v19 = vmul.f32 0.70710677, %v2068_v20  ;;  %1731 = verf.f32 %v721_v14 }
 0x16c   :  { %v1720_v5 = vpop.eup %1719  ;;  %v566_v22 = vpop.f32.mrf.mxu0  ;;  %v834_v29 = vadd.f32 1.0, %v1718_v16  ;;  %v893_v54 = vmul.f32 %v833_v39, %v653_v47  ;;  %v657_v9 = vmul.f32 0.5, %v2040_v11 }
 0x16d   :  { %v835_v26 = vadd.f32 1.0, %v1720_v5  ;;  %v723_v27 = vmul.f32 0.70710677, %v2071_v17  ;;  %v2076_v28 = vadd.f32 %v566_v22, %v1933_v36  ;;  %1245 = vmatprep.mubr.bf16.mxu1 %v940_v18  ;;  %1733 = verf.f32 %v722_v19 }
 0x16e   :  { %v570_v30 = vpop.f32.mrf.mxu0  ;;  %v1722_v37 = vpop.eup %1721  ;;  %1246 = vmatmul.mubr.bf16.gmra.mxu1 %v939_v24  ;;  %v894_v13 = vmul.f32 %v834_v29, %v654_v42  ;;  %v663_v29 = vmul.f32 0.5, %v2071_v17 }
 0x16f   :  { %1735 = verf.f32 %v723_v27  ;;  %v724_v38 = vmul.f32 0.70710677, %v2076_v28  ;;  %v836_v2 = vadd.f32 1.0, %v1722_v37  ;;  %v2083_v45 = vadd.f32 %v570_v30, %v1929_v35 }
 0x170   :  { %v572_v46 = vpop.f32.mrf.mxu0  ;;  %v895_v48 = vmul.f32 %v835_v26, %v655_v40 }
 0x171   :  { %1737 = verf.f32 %v724_v38  ;;  %v2087_v0 = vadd.f32 %v572_v46, %v1933_v36  ;;  %v896_v21 = vmul.f32 %v836_v2, %v656_v8  ;;  %v725_v49 = vmul.f32 0.70710677, %v2083_v45 }
 0x172   :  { %v574_v51 = vpop.f32.mrf.mxu0  ;;  %v1724_v53 = vpop.eup %1723  ;;  %v941_v62 = vpack.c.bf16 %v895_v48, %v893_v54  ;;  %v664_v8 = vmul.f32 0.5, %v2076_v28 }
 0x173   :  { %v726_v23 = vmul.f32 0.70710677, %v2087_v0  ;;  %v2092_v55 = vadd.f32 %v574_v51, %v1929_v35  ;;  %v1726_v57 = vpop.eup %1725  ;;  %v838_v58 = vadd.f32 1.0, %v1724_v53  ;;  %v942_v56 = vpack.c.bf16 %v896_v21, %v894_v13 }
 0x174   :  { %v576_v25 = vpop.f32.mrf.mxu0  ;;  %1739 = verf.f32 %v725_v49  ;;  %v837_v44 = vadd.f32 1.0, %v1726_v57  ;;  %v662_v13 = vmul.f32 0.5, %v2068_v20  ;;  %v661_v51 = vmul.f32 0.5, %v2063_v6 }
 0x175   :  { %v1728_v33 = vpop.eup %1727  ;;  %v727_v59 = vmul.f32 0.70710677, %v2092_v55  ;;  %v2097_v63 = vadd.f32 %v576_v25, %v1933_v36  ;;  %1741 = verf.f32 %v726_v23  ;;  %1255 = vmatprep.mubr.bf16.mxu1 %v942_v56  ;;  %v898_v10 = vmul.f32 %v838_v58, %v658_v41 }
 0x176   :  { %v1730_v1 = vpop.eup %1729  ;;  %v839_v4 = vadd.f32 1.0, %v1728_v33  ;;  %v580_v43 = vpop.f32.mrf.mxu0  ;;  %1256 = vmatmul.mubr.bf16.gmra.mxu1 %v941_v62  ;;  %v897_v22 = vmul.f32 %v837_v44, %v657_v9  ;;  %v667_v44 = vmul.f32 0.5, %v2092_v55 }
 0x177   :  { %v840_v7 = vadd.f32 1.0, %v1730_v1  ;;  %1743 = verf.f32 %v727_v59  ;;  %v728_v50 = vmul.f32 0.70710677, %v2097_v63  ;;  %v2104_v12 = vadd.f32 %v580_v43, %v1929_v35 }
 0x178   :  { %v582_v14 = vpop.f32.mrf.mxu0  ;;  %v899_v61 = vmul.f32 %v839_v4, %v659_v3  ;;  %v1732_v16 = vpop.eup %1731 }
 0x179   :  { %v900_v15 = vmul.f32 %v840_v7, %v660_v52  ;;  %1745 = verf.f32 %v728_v50  ;;  %v2107_v60 = vadd.f32 %v582_v14, %v1933_v36  ;;  %v729_v18 = vmul.f32 0.70710677, %v2104_v12 }
 0x17a   :  { %v584_v5 = vpop.f32.mrf.mxu0  ;;  %v1734_v19 = vpop.eup %1733  ;;  %v943_v40 = vpack.c.bf16 %v899_v61, %v897_v22  ;;  %v841_v47 = vadd.f32 1.0, %v1732_v16  ;;  %v666_v16 = vmul.f32 0.5, %v2087_v0 }
 0x17b   :  { %v730_v24 = vmul.f32 0.70710677, %v2107_v60  ;;  %v2112_v11 = vadd.f32 %v584_v5, %v1929_v35  ;;  %v944_v26 = vpack.c.bf16 %v900_v15, %v898_v10  ;;  %1747 = verf.f32 %v729_v18 }
 0x17c   :  { %v1736_v27 = vpop.eup %1735  ;;  %v586_v30 = vpop.f32.mrf.mxu0  ;;  %v842_v42 = vadd.f32 1.0, %v1734_v19  ;;  %v901_v56 = vmul.f32 %v841_v47, %v661_v51  ;;  %v668_v10 = vmul.f32 0.5, %v2097_v63  ;;  %v665_v15 = vmul.f32 0.5, %v2083_v45 }
 0x17d   :  { %v843_v37 = vadd.f32 1.0, %v1736_v27  ;;  %v731_v39 = vmul.f32 0.70710677, %v2112_v11  ;;  %1265 = vmatprep.mubr.bf16.mxu1 %v944_v26  ;;  %1749 = verf.f32 %v730_v24  ;;  %v2118_v2 = vadd.f32 %v586_v30, %v1933_v36 }
 0x17e   :  { %v1738_v38 = vpop.eup %1737  ;;  %v590_v46 = vpop.f32.mrf.mxu0  ;;  %1266 = vmatmul.mubr.bf16.gmra.mxu1 %v943_v40  ;;  %v902_v57 = vmul.f32 %v842_v42, %v662_v13  ;;  %v671_v51 = vmul.f32 0.5, %v2112_v11 }
 0x17f   :  { %v844_v48 = vadd.f32 1.0, %v1738_v38  ;;  %1751 = verf.f32 %v731_v39  ;;  %v2121_v17 = vadd.f32 %v590_v46, %v1929_v35  ;;  %v732_v21 = vmul.f32 0.70710677, %v2118_v2 }
 0x180   :  { %v592_v49 = vpop.f32.mrf.mxu0  ;;  %v903_v28 = vmul.f32 %v843_v37, %v663_v29  ;;  %v670_v38 = vmul.f32 0.5, %v2107_v60  ;;  %v672_v60 = vmul.f32 0.5, %v2118_v2 }
 0x181   :  { %v904_v53 = vmul.f32 %v844_v48, %v664_v8  ;;  %v2127_v54 = vadd.f32 %v592_v49, %v1933_v36  ;;  %v1740_v23 = vpop.eup %1739  ;;  %1753 = verf.f32 %v732_v21  ;;  %v733_v41 = vmul.f32 0.70710677, %v2121_v17 }
 0x182   :  { %v594_v58 = vpop.f32.mrf.mxu0  ;;  %v1742_v25 = vpop.eup %1741  ;;  %v945_v4 = vpack.c.bf16 %v903_v28, %v901_v56  ;;  %v845_v9 = vadd.f32 1.0, %v1740_v23 }
 0x183   :  { %v734_v20 = vmul.f32 0.70710677, %v2127_v54  ;;  %v2132_v59 = vadd.f32 %v594_v58, %v1929_v35  ;;  %v946_v62 = vpack.c.bf16 %v904_v53, %v902_v57  ;;  %v846_v43 = vadd.f32 1.0, %v1742_v25 }
 0x184   :  { %v1744_v33 = vpop.eup %1743  ;;  %v596_v6 = vpop.f32.mrf.mxu0  ;;  %v905_v29 = vmul.f32 %v845_v9, %v665_v15  ;;  %v674_v2 = vmul.f32 0.5, %v2127_v54 }
 0x185   :  { %v847_v1 = vadd.f32 1.0, %v1744_v33  ;;  %1755 = verf.f32 %v734_v20  ;;  %v2135_v3 = vadd.f32 %v596_v6, %v1933_v36  ;;  %v735_v7 = vmul.f32 0.70710677, %v2132_v59  ;;  %1275 = vmatprep.mubr.bf16.mxu1 %v946_v62 }
 0x186   :  { %v1746_v52 = vpop.eup %1745  ;;  %1757 = verf.f32 %v733_v41  ;;  %v600_v50 = vpop.f32.mrf.mxu0  ;;  %1276 = vmatmul.mubr.bf16.gmra.mxu1 %v945_v4  ;;  %v906_v24 = vmul.f32 %v846_v43, %v666_v16  ;;  %v669_v41 = vmul.f32 0.5, %v2104_v12 }
 0x187   :  { %v848_v14 = vadd.f32 1.0, %v1746_v52  ;;  %v736_v61 = vmul.f32 0.70710677, %v2135_v3  ;;  %1759 = verf.f32 %v735_v7  ;;  %v2144_v18 = vadd.f32 %v600_v50, %v1929_v35 }
 0x188   :  { %v602_v55 = vpop.f32.mrf.mxu0  ;;  %v907_v5 = vmul.f32 %v847_v1, %v667_v44  ;;  %v1748_v63 = vpop.eup %1747  ;;  %v675_v50 = vmul.f32 0.5, %v2132_v59  ;;  %v676_v9 = vmul.f32 0.5, %v2135_v3  ;;  %v673_v3 = vmul.f32 0.5, %v2121_v17 }
 0x189   :  { %v908_v19 = vmul.f32 %v848_v14, %v668_v10  ;;  %1761 = verf.f32 %v736_v61  ;;  %v2147_v22 = vadd.f32 %v602_v55, %v1933_v36  ;;  %v737_v45 = vmul.f32 0.70710677, %v2144_v18 }
 0x18a   :  { %v604_v26 = vpop.f32.mrf.mxu0  ;;  %v1750_v27 = vpop.eup %1749  ;;  %v947_v8 = vpack.c.bf16 %v907_v5, %v905_v29  ;;  %v849_v49 = vadd.f32 1.0, %v1748_v63 }
 0x18b   :  { %v738_v0 = vmul.f32 0.70710677, %v2147_v22  ;;  %v2152_v30 = vadd.f32 %v604_v26, %v1929_v35  ;;  %v948_v40 = vpack.c.bf16 %v908_v19, %v906_v24  ;;  %v850_v46 = vadd.f32 1.0, %v1750_v27 }
 0x18c   :  { %v1752_v37 = vpop.eup %1751  ;;  %v606_v39 = vpop.f32.mrf.mxu0  ;;  %v909_v62 = vmul.f32 %v849_v49, %v669_v41 }
 0x18d   :  { %v851_v42 = vadd.f32 1.0, %v1752_v37  ;;  %1763 = verf.f32 %v738_v0  ;;  %v739_v47 = vmul.f32 0.70710677, %v2152_v30  ;;  %v2157_v48 = vadd.f32 %v606_v39, %v1933_v36  ;;  %1285 = vmatprep.mubr.bf16.mxu1 %v948_v40 }
 0x18e   :  { %v610_v13 = vpop.f32.mrf.mxu0  ;;  %v1754_v21 = vpop.eup %1753  ;;  %1765 = verf.f32 %v737_v45  ;;  %1286 = vmatmul.mubr.bf16.gmra.mxu1 %v947_v8  ;;  %v910_v11 = vmul.f32 %v850_v46, %v670_v38 }
 0x18f   :  { %v2161_v28 = vadd.f32 %v610_v13, %v1929_v35  ;;  %v852_v53 = vadd.f32 1.0, %v1754_v21  ;;  %1767 = verf.f32 %v739_v47  ;;  %v740_v23 = vmul.f32 0.70710677, %v2157_v48 }
 0x190   :  { %v612_v57 = vpop.f32.mrf.mxu0  ;;  %v911_v58 = vmul.f32 %v851_v42, %v671_v51  ;;  %v680_v41 = vmul.f32 0.5, %v2157_v48 }
 0x191   :  { %v2167_v25 = vadd.f32 %v612_v57, %v1933_v36  ;;  %v912_v20 = vmul.f32 %v852_v53, %v672_v60  ;;  %1769 = verf.f32 %v740_v23  ;;  %v741_v1 = vmul.f32 0.70710677, %v2161_v28 }
 0x192   :  { %v1756_v56 = vpop.eup %1755  ;;  %v614_v33 = vpop.f32.mrf.mxu0  ;;  %v949_v14 = vpack.c.bf16 %v911_v58, %v909_v62  ;;  %v679_v23 = vmul.f32 0.5, %v2152_v30  ;;  %v678_v57 = vmul.f32 0.5, %v2147_v22 }
 0x193   :  { %v1758_v6 = vpop.eup %1757  ;;  %v854_v4 = vadd.f32 1.0, %v1756_v56  ;;  %v742_v52 = vmul.f32 0.70710677, %v2167_v25  ;;  %v2173_v12 = vadd.f32 %v614_v33, %v1929_v35  ;;  %v950_v44 = vpack.c.bf16 %v912_v20, %v910_v11 }
 0x194   :  { %v616_v43 = vpop.f32.mrf.mxu0  ;;  %v1760_v7 = vpop.eup %1759  ;;  %v853_v61 = vadd.f32 1.0, %v1758_v6  ;;  %v677_v56 = vmul.f32 0.5, %v2144_v18 }
 0x195   :  { %v2178_v10 = vadd.f32 %v616_v43, %v1933_v36  ;;  %v855_v15 = vadd.f32 1.0, %v1760_v7  ;;  %1771 = verf.f32 %v742_v52  ;;  %v743_v16 = vmul.f32 0.70710677, %v2173_v12  ;;  %1295 = vmatprep.mubr.bf16.mxu1 %v950_v44 }
 0x196   :  { %v1762_v54 = vpop.eup %1761  ;;  %v620_v55 = vpop.f32.mrf.mxu0  ;;  %1773 = verf.f32 %v741_v1  ;;  %1296 = vmatmul.mubr.bf16.gmra.mxu1 %v949_v14  ;;  %v914_v63 = vmul.f32 %v854_v4, %v674_v2  ;;  %v913_v39 = vmul.f32 %v853_v61, %v673_v3  ;;  %v682_v43 = vmul.f32 0.5, %v2167_v25 }
 0x197   :  { %v856_v5 = vadd.f32 1.0, %v1762_v54  ;;  %v744_v19 = vmul.f32 0.70710677, %v2178_v10  ;;  %v2183_v59 = vadd.f32 %v620_v55, %v1929_v35  ;;  %1775 = verf.f32 %v743_v16 }
 0x198   :  { %v622_v24 = vpop.f32.mrf.mxu0  ;;  %v915_v26 = vmul.f32 %v855_v15, %v675_v50  ;;  %v683_v44 = vmul.f32 0.5, %v2173_v12  ;;  %v684_v18 = vmul.f32 0.5, %v2178_v10  ;;  %v681_v50 = vmul.f32 0.5, %v2161_v28 }
 0x199   :  { %v916_v27 = vmul.f32 %v856_v5, %v676_v9  ;;  %1777 = verf.f32 %v744_v19  ;;  %v745_v29 = vmul.f32 0.70710677, %v2183_v59  ;;  %v623_v45 = vadd.f32 %v622_v24, %v1933_v36 }
 0x19a   :  { %v624_v0 = vpop.f32.mrf.mxu0  ;;  %v1764_v37 = vpop.eup %1763  ;;  %v951_v21 = vpack.c.bf16 %v915_v26, %v913_v39  ;;  %v685_v28 = vmul.f32 0.5, %v2183_v59 }
 0x19b   :  { %v625_v40 = vadd.f32 %v624_v0, %v1929_v35  ;;  %v952_v38 = vpack.c.bf16 %v916_v27, %v914_v63  ;;  %v1766_v42 = vpop.eup %1765  ;;  %v746_v8 = vmul.f32 0.70710677, %v623_v45  ;;  %1779 = verf.f32 %v745_v29 }
 0x19c   :  { %v626_v46 = vpop.f32.mrf.mxu0  ;;  %v1768_v17 = vpop.eup %1767  ;;  %v858_v49 = vadd.f32 1.0, %v1764_v37  ;;  %v857_v53 = vadd.f32 1.0, %v1766_v42  ;;  %v686_v12 = vmul.f32 0.5, %v623_v45 }
 0x19d   :  { %v747_v47 = vmul.f32 0.70710677, %v625_v40  ;;  %v627_v13 = vadd.f32 %v626_v46, %v1933_v36  ;;  %1305 = vmatprep.mubr.bf16.mxu1 %v952_v38  ;;  %v859_v51 = vadd.f32 1.0, %v1768_v17  ;;  %1781 = verf.f32 %v746_v8  ;;  %v991_v8 = vld [vmem:[%s2277_s4] sm:$0x3]  ;;  %s1878_s4 = smov [#allocation8]  }
 0x19e   :  { %v1770_v60 = vpop.eup %1769  ;;  %1306 = vmatmul.mubr.bf16.gmra.mxu1 %v951_v21  ;;  %v918_v11 = vmul.f32 %v858_v49, %v678_v57  ;;  %v917_v6 = vmul.f32 %v857_v53, %v677_v56  ;;  %v687_v10 = vmul.f32 0.5, %v625_v40  ;;  %v2204_v45 = vrot.slane %v991_v8, %v128_v32  ;;  %s1411_s10 = sshll.u32 %s1878_s4, 4  ;;  %s1412_s10 = int_to_ptr.vmem [resolvable:$true] %s1411_s10 }
 0x19f   :  { %1783 = verf.f32 %v747_v47  ;;  %v748_v35 = vmul.f32 0.70710677, %v627_v13  ;;  %v860_v58 = vadd.f32 1.0, %v1770_v60  ;;  %v919_v36 = vmul.f32 %v859_v51, %v679_v23  ;;  %s1847_s11 = scalar_lea.vmem %s1412_s10, 7680  ;;  %p1852_p2 = scmp.lt.s32.totalorder %s1412_s10, %s1412_s10 }
 0x1a0   :  { %v688_v26 = vmul.f32 0.5, %v627_v13  ;;  %v2208_v40 = vrot.slane %v991_v8, %v132_v34  ;;  %p1848_p1 = scmp.ne.s32.totalorder %s1412_s10, %s1847_s11  ;;  %p1853_p3 = scmp.lt.s32.totalorder %s1847_s11, %s1847_s11 }
 0x1a1   :  { %1785 = verf.f32 %v748_v35  ;;  %v920_v20 = vmul.f32 %v860_v58, %v680_v41  ;;  %v953_v4 = vpack.c.bf16 %v919_v36, %v917_v6 }
 0x1a2   :  { %v1772_v33 = vpop.eup %1771  ;;  %p1854_p4 = por %p1853_p3, %p1852_p2 }
 0x1a3   :  { %v1774_v62 = vpop.eup %1773  ;;  %v954_v2 = vpack.c.bf16 %v920_v20, %v918_v11  ;;  %v862_v30 = vadd.f32 1.0, %v1772_v33 }
 0x1a4   :  { %v1776_v1 = vpop.eup %1775  ;;  %v861_v48 = vadd.f32 1.0, %v1774_v62  ;;  %p1855_p5 = pnand %p1854_p4, %p1848_p1 }
 0x1a5   :  { %v863_v22 = vadd.f32 1.0, %v1776_v1  ;;  %1315 = vmatprep.mubr.bf16.mxu1 %v954_v2  ;;  %v922_v9 = vmul.f32 %v862_v30, %v682_v43 }
 0x1a6   :  { %v1778_v52 = vpop.eup %1777  ;;  %1316 = vmatmul.mubr.bf16.gmra.mxu1 %v953_v4  ;;  %v921_v16 = vmul.f32 %v861_v48, %v681_v50 }
 0x1a7   :  { %v864_v7 = vadd.f32 1.0, %v1778_v52  ;;  %v923_v14 = vmul.f32 %v863_v22, %v683_v44 }
 0x1a8   :  { %v1780_v61 = vpop.eup %1779 }
 0x1a9   :  { %v924_v54 = vmul.f32 %v864_v7, %v684_v18  ;;  %v955_v3 = vpack.c.bf16 %v923_v14, %v921_v16  ;;  %v865_v24 = vadd.f32 1.0, %v1780_v61 }
 0x1aa   :  { %v1782_v15 = vpop.eup %1781 }
 0x1ab   :  { %v956_v55 = vpack.c.bf16 %v924_v54, %v922_v9  ;;  %v866_v25 = vadd.f32 1.0, %v1782_v15  ;;  %v925_v39 = vmul.f32 %v865_v24, %v685_v28 }
 0x1ac   :  { %v1784_v5 = vpop.eup %1783 }
 0x1ad   :  { %v867_v19 = vadd.f32 1.0, %v1784_v5  ;;  %1325 = vmatprep.mubr.bf16.mxu1 %v956_v55  ;;  %v926_v29 = vmul.f32 %v866_v25, %v686_v12 }
 0x1ae   :  { %v1786_v63 = vpop.eup %1785  ;;  %1326 = vmatmul.mubr.bf16.gmra.mxu1 %v955_v3 }
 0x1af   :  { %v868_v27 = vadd.f32 1.0, %v1786_v63  ;;  %v927_v0 = vmul.f32 %v867_v19, %v687_v10 }
 0x1b1   :  { %v928_v37 = vmul.f32 %v868_v27, %v688_v26  ;;  %v957_v42 = vpack.c.bf16 %v927_v0, %v925_v39 }
 0x1b3   :  { %v958_v38 = vpack.c.bf16 %v928_v37, %v926_v29 }
 0x1b5   :  { %1335 = vmatprep.mubr.bf16.mxu1 %v958_v38 }
 0x1b6   :  { %1336 = vmatmul.mubr.bf16.gmra.mxu1 %v957_v42 }
 0x206   :  { %v1197_v59 = vpop.f32.mrf.mxu1 }
 0x207   :  { %v1198_v46 = vadd.f32 %v1197_v59, %v2204_v45 }
 0x208   :  { %v1199_v17 = vpop.f32.mrf.mxu1 }
 0x209   :  { %1346 = vst [vmem:[#allocation8] sm:$0xff] %v1198_v46  ;;  %v1200_v47 = vadd.f32 %v1199_v17, %v2208_v40 }
 0x20a   :  { %v1201_v13 = vpop.f32.mrf.mxu1 }
 0x20b   :  { %1347 = vst [vmem:[#allocation8 + $0x8] sm:$0xff] %v1200_v47  ;;  %v1202_v21 = vadd.f32 %v1201_v13, %v2204_v45 }
 0x20c   :  { %v1203_v49 = vpop.f32.mrf.mxu1 }
 0x20d   :  { %1348 = vst [vmem:[#allocation8 + $0x10] sm:$0xff] %v1202_v21  ;;  %v1204_v32 = vadd.f32 %v1203_v49, %v2208_v40 }
 0x20e   :  { %v1207_v51 = vpop.f32.mrf.mxu1 }
 0x20f   :  { %1349 = vst [vmem:[#allocation8 + $0x18] sm:$0xff] %v1204_v32  ;;  %v1208_v31 = vadd.f32 %v1207_v51, %v2204_v45 }
 0x210   :  { %v1209_v34 = vpop.f32.mrf.mxu1 }
 0x211   :  { %1350 = vst [vmem:[#allocation8 + $0x20] sm:$0xff] %v1208_v31  ;;  %v1210_v60 = vadd.f32 %v1209_v34, %v2208_v40 }
 0x212   :  { %v1211_v53 = vpop.f32.mrf.mxu1 }
 0x213   :  { %1351 = vst [vmem:[#allocation8 + $0x28] sm:$0xff] %v1210_v60  ;;  %v1212_v23 = vadd.f32 %v1211_v53, %v2204_v45 }
 0x214   :  { %v1213_v35 = vpop.f32.mrf.mxu1 }
 0x215   :  { %1352 = vst [vmem:[#allocation8 + $0x30] sm:$0xff] %v1212_v23  ;;  %v1214_v57 = vadd.f32 %v1213_v35, %v2208_v40 }
 0x216   :  { %v1217_v41 = vpop.f32.mrf.mxu1 }
 0x217   :  { %1353 = vst [vmem:[#allocation8 + $0x38] sm:$0xff] %v1214_v57  ;;  %v1218_v58 = vadd.f32 %v1217_v41, %v2204_v45 }
 0x218   :  { %v1219_v56 = vpop.f32.mrf.mxu1 }
 0x219   :  { %1354 = vst [vmem:[#allocation8 + $0x40] sm:$0xff] %v1218_v58  ;;  %v1220_v36 = vadd.f32 %v1219_v56, %v2208_v40 }
 0x21a   :  { %v1221_v11 = vpop.f32.mrf.mxu1 }
 0x21b   :  { %1355 = vst [vmem:[#allocation8 + $0x48] sm:$0xff] %v1220_v36  ;;  %v1222_v20 = vadd.f32 %v1221_v11, %v2204_v45 }
 0x21c   :  { %v1223_v33 = vpop.f32.mrf.mxu1 }
 0x21d   :  { %1356 = vst [vmem:[#allocation8 + $0x50] sm:$0xff] %v1222_v20  ;;  %v1224_v6 = vadd.f32 %v1223_v33, %v2208_v40 }
 0x21e   :  { %v1227_v62 = vpop.f32.mrf.mxu1 }
 0x21f   :  { %1357 = vst [vmem:[#allocation8 + $0x58] sm:$0xff] %v1224_v6  ;;  %v1228_v2 = vadd.f32 %v1227_v62, %v2204_v45 }
 0x220   :  { %v1229_v1 = vpop.f32.mrf.mxu1 }
 0x221   :  { %1358 = vst [vmem:[#allocation8 + $0x60] sm:$0xff] %v1228_v2  ;;  %v1230_v30 = vadd.f32 %v1229_v1, %v2208_v40 }
 0x222   :  { %v1231_v4 = vpop.f32.mrf.mxu1 }
 0x223   :  { %1359 = vst [vmem:[#allocation8 + $0x68] sm:$0xff] %v1230_v30  ;;  %v1232_v52 = vadd.f32 %v1231_v4, %v2204_v45 }
 0x224   :  { %v1233_v43 = vpop.f32.mrf.mxu1 }
 0x225   :  { %1360 = vst [vmem:[#allocation8 + $0x70] sm:$0xff] %v1232_v52  ;;  %v1234_v22 = vadd.f32 %v1233_v43, %v2208_v40 }
 0x226   :  { %v1237_v48 = vpop.f32.mrf.mxu1 }
 0x227   :  { %1361 = vst [vmem:[#allocation8 + $0x78] sm:$0xff] %v1234_v22  ;;  %v1238_v44 = vadd.f32 %v1237_v48, %v2204_v45 }
 0x228   :  { %v1239_v18 = vpop.f32.mrf.mxu1 }
 0x229   :  { %1362 = vst [vmem:[#allocation8 + $0x80] sm:$0xff] %v1238_v44  ;;  %v1240_v7 = vadd.f32 %v1239_v18, %v2208_v40 }
 0x22a   :  { %v1241_v50 = vpop.f32.mrf.mxu1 }
 0x22b   :  { %1363 = vst [vmem:[#allocation8 + $0x88] sm:$0xff] %v1240_v7  ;;  %v1242_v9 = vadd.f32 %v1241_v50, %v2204_v45 }
 0x22c   :  { %v1243_v14 = vpop.f32.mrf.mxu1 }
 0x22d   :  { %1364 = vst [vmem:[#allocation8 + $0x90] sm:$0xff] %v1242_v9  ;;  %v1244_v54 = vadd.f32 %v1243_v14, %v2208_v40 }
 0x22e   :  { %v1247_v61 = vpop.f32.mrf.mxu1 }
 0x22f   :  { %1365 = vst [vmem:[#allocation8 + $0x98] sm:$0xff] %v1244_v54  ;;  %v1248_v15 = vadd.f32 %v1247_v61, %v2204_v45 }
 0x230   :  { %v1249_v16 = vpop.f32.mrf.mxu1 }
 0x231   :  { %1366 = vst [vmem:[#allocation8 + $0xa0] sm:$0xff] %v1248_v15  ;;  %v1250_v55 = vadd.f32 %v1249_v16, %v2208_v40 }
 0x232   :  { %v1251_v5 = vpop.f32.mrf.mxu1 }
 0x233   :  { %1367 = vst [vmem:[#allocation8 + $0xa8] sm:$0xff] %v1250_v55  ;;  %v1252_v25 = vadd.f32 %v1251_v5, %v2204_v45 }
 0x234   :  { %v1253_v19 = vpop.f32.mrf.mxu1 }
 0x235   :  { %1368 = vst [vmem:[#allocation8 + $0xb0] sm:$0xff] %v1252_v25  ;;  %v1254_v3 = vadd.f32 %v1253_v19, %v2208_v40 }
 0x236   :  { %v1257_v63 = vpop.f32.mrf.mxu1 }
 0x237   :  { %1369 = vst [vmem:[#allocation8 + $0xb8] sm:$0xff] %v1254_v3  ;;  %v1258_v12 = vadd.f32 %v1257_v63, %v2204_v45 }
 0x238   :  { %v1259_v24 = vpop.f32.mrf.mxu1 }
 0x239   :  { %1370 = vst [vmem:[#allocation8 + $0xc0] sm:$0xff] %v1258_v12  ;;  %v1260_v10 = vadd.f32 %v1259_v24, %v2208_v40 }
 0x23a   :  { %v1261_v26 = vpop.f32.mrf.mxu1 }
 0x23b   :  { %1371 = vst [vmem:[#allocation8 + $0xc8] sm:$0xff] %v1260_v10  ;;  %v1262_v27 = vadd.f32 %v1261_v26, %v2204_v45 }
 0x23c   :  { %v1263_v28 = vpop.f32.mrf.mxu1 }
 0x23d   :  { %1372 = vst [vmem:[#allocation8 + $0xd0] sm:$0xff] %v1262_v27  ;;  %v1264_v29 = vadd.f32 %v1263_v28, %v2208_v40 }
 0x23e   :  { %v1267_v0 = vpop.f32.mrf.mxu1 }
 0x23f   :  { %1373 = vst [vmem:[#allocation8 + $0xd8] sm:$0xff] %v1264_v29  ;;  %v1268_v37 = vadd.f32 %v1267_v0, %v2204_v45 }
 0x240   :  { %v1269_v39 = vpop.f32.mrf.mxu1 }
 0x241   :  { %1374 = vst [vmem:[#allocation8 + $0xe0] sm:$0xff] %v1268_v37  ;;  %v1270_v38 = vadd.f32 %v1269_v39, %v2208_v40 }
 0x242   :  { %v1271_v42 = vpop.f32.mrf.mxu1 }
 0x243   :  { %1375 = vst [vmem:[#allocation8 + $0xe8] sm:$0xff] %v1270_v38  ;;  %v1272_v8 = vadd.f32 %v1271_v42, %v2204_v45 }
 0x244   :  { %v1273_v59 = vpop.f32.mrf.mxu1 }
 0x245   :  { %1376 = vst [vmem:[#allocation8 + $0xf0] sm:$0xff] %v1272_v8  ;;  %v1274_v46 = vadd.f32 %v1273_v59, %v2208_v40 }
 0x246   :  { %v1277_v17 = vpop.f32.mrf.mxu1 }
 0x247   :  { %1377 = vst [vmem:[#allocation8 + $0xf8] sm:$0xff] %v1274_v46  ;;  %v1278_v47 = vadd.f32 %v1277_v17, %v2204_v45 }
 0x248   :  { %v1279_v13 = vpop.f32.mrf.mxu1 }
 0x249   :  { %1378 = vst [vmem:[#allocation8 + $0x100] sm:$0xff] %v1278_v47  ;;  %v1280_v21 = vadd.f32 %v1279_v13, %v2208_v40 }
 0x24a   :  { %v1281_v49 = vpop.f32.mrf.mxu1 }
 0x24b   :  { %1379 = vst [vmem:[#allocation8 + $0x108] sm:$0xff] %v1280_v21  ;;  %v1282_v32 = vadd.f32 %v1281_v49, %v2204_v45 }
 0x24c   :  { %v1283_v51 = vpop.f32.mrf.mxu1 }
 0x24d   :  { %1380 = vst [vmem:[#allocation8 + $0x110] sm:$0xff] %v1282_v32  ;;  %v1284_v31 = vadd.f32 %v1283_v51, %v2208_v40 }
 0x24e   :  { %v1287_v34 = vpop.f32.mrf.mxu1 }
 0x24f   :  { %1381 = vst [vmem:[#allocation8 + $0x118] sm:$0xff] %v1284_v31  ;;  %v1288_v60 = vadd.f32 %v1287_v34, %v2204_v45 }
 0x250   :  { %v1289_v53 = vpop.f32.mrf.mxu1 }
 0x251   :  { %1382 = vst [vmem:[#allocation8 + $0x120] sm:$0xff] %v1288_v60  ;;  %v1290_v23 = vadd.f32 %v1289_v53, %v2208_v40 }
 0x252   :  { %v1291_v35 = vpop.f32.mrf.mxu1 }
 0x253   :  { %1383 = vst [vmem:[#allocation8 + $0x128] sm:$0xff] %v1290_v23  ;;  %v1292_v57 = vadd.f32 %v1291_v35, %v2204_v45 }
 0x254   :  { %v1293_v41 = vpop.f32.mrf.mxu1 }
 0x255   :  { %1384 = vst [vmem:[#allocation8 + $0x130] sm:$0xff] %v1292_v57  ;;  %v1294_v58 = vadd.f32 %v1293_v41, %v2208_v40 }
 0x256   :  { %v1297_v56 = vpop.f32.mrf.mxu1 }
 0x257   :  { %1385 = vst [vmem:[#allocation8 + $0x138] sm:$0xff] %v1294_v58  ;;  %v1298_v36 = vadd.f32 %v1297_v56, %v2204_v45 }
 0x258   :  { %v1299_v11 = vpop.f32.mrf.mxu1 }
 0x259   :  { %1386 = vst [vmem:[#allocation8 + $0x140] sm:$0xff] %v1298_v36  ;;  %v1300_v20 = vadd.f32 %v1299_v11, %v2208_v40 }
 0x25a   :  { %v1301_v33 = vpop.f32.mrf.mxu1 }
 0x25b   :  { %1387 = vst [vmem:[#allocation8 + $0x148] sm:$0xff] %v1300_v20  ;;  %v1302_v6 = vadd.f32 %v1301_v33, %v2204_v45 }
 0x25c   :  { %v1303_v62 = vpop.f32.mrf.mxu1 }
 0x25d   :  { %1388 = vst [vmem:[#allocation8 + $0x150] sm:$0xff] %v1302_v6  ;;  %v1304_v2 = vadd.f32 %v1303_v62, %v2208_v40 }
 0x25e   :  { %v1307_v1 = vpop.f32.mrf.mxu1 }
 0x25f   :  { %1389 = vst [vmem:[#allocation8 + $0x158] sm:$0xff] %v1304_v2  ;;  %v1308_v30 = vadd.f32 %v1307_v1, %v2204_v45 }
 0x260   :  { %v1309_v4 = vpop.f32.mrf.mxu1 }
 0x261   :  { %1390 = vst [vmem:[#allocation8 + $0x160] sm:$0xff] %v1308_v30  ;;  %v1310_v52 = vadd.f32 %v1309_v4, %v2208_v40 }
 0x262   :  { %v1311_v43 = vpop.f32.mrf.mxu1 }
 0x263   :  { %1391 = vst [vmem:[#allocation8 + $0x168] sm:$0xff] %v1310_v52  ;;  %v1312_v22 = vadd.f32 %v1311_v43, %v2204_v45 }
 0x264   :  { %v1313_v48 = vpop.f32.mrf.mxu1 }
 0x265   :  { %1392 = vst [vmem:[#allocation8 + $0x170] sm:$0xff] %v1312_v22  ;;  %v1314_v44 = vadd.f32 %v1313_v48, %v2208_v40 }
 0x266   :  { %v1317_v18 = vpop.f32.mrf.mxu1 }
 0x267   :  { %1393 = vst [vmem:[#allocation8 + $0x178] sm:$0xff] %v1314_v44  ;;  %v1318_v7 = vadd.f32 %v1317_v18, %v2204_v45 }
 0x268   :  { %v1319_v50 = vpop.f32.mrf.mxu1 }
 0x269   :  { %1394 = vst [vmem:[#allocation8 + $0x180] sm:$0xff] %v1318_v7  ;;  %v1320_v9 = vadd.f32 %v1319_v50, %v2208_v40 }
 0x26a   :  { %v1321_v14 = vpop.f32.mrf.mxu1 }
 0x26b   :  { %1395 = vst [vmem:[#allocation8 + $0x188] sm:$0xff] %v1320_v9  ;;  %v1322_v54 = vadd.f32 %v1321_v14, %v2204_v45 }
 0x26c   :  { %v1323_v61 = vpop.f32.mrf.mxu1 }
 0x26d   :  { %1396 = vst [vmem:[#allocation8 + $0x190] sm:$0xff] %v1322_v54  ;;  %v1324_v15 = vadd.f32 %v1323_v61, %v2208_v40 }
 0x26e   :  { %v1327_v16 = vpop.f32.mrf.mxu1 }
 0x26f   :  { %1397 = vst [vmem:[#allocation8 + $0x198] sm:$0xff] %v1324_v15  ;;  %v1328_v55 = vadd.f32 %v1327_v16, %v2204_v45 }
 0x270   :  { %v1329_v5 = vpop.f32.mrf.mxu1 }
 0x271   :  { %1398 = vst [vmem:[#allocation8 + $0x1a0] sm:$0xff] %v1328_v55  ;;  %v1330_v25 = vadd.f32 %v1329_v5, %v2208_v40 }
 0x272   :  { %v1331_v19 = vpop.f32.mrf.mxu1 }
 0x273   :  { %1399 = vst [vmem:[#allocation8 + $0x1a8] sm:$0xff] %v1330_v25  ;;  %v1332_v3 = vadd.f32 %v1331_v19, %v2204_v45 }
 0x274   :  { %v1333_v63 = vpop.f32.mrf.mxu1 }
 0x275   :  { %1400 = vst [vmem:[#allocation8 + $0x1b0] sm:$0xff] %v1332_v3  ;;  %v1334_v12 = vadd.f32 %v1333_v63, %v2208_v40 }
 0x276   :  { %v1337_v24 = vpop.f32.mrf.mxu1 }
 0x277   :  { %1401 = vst [vmem:[#allocation8 + $0x1b8] sm:$0xff] %v1334_v12  ;;  %v1338_v10 = vadd.f32 %v1337_v24, %v2204_v45 }
 0x278   :  { %v1339_v26 = vpop.f32.mrf.mxu1 }
 0x279   :  { %1402 = vst [vmem:[#allocation8 + $0x1c0] sm:$0xff] %v1338_v10  ;;  %v1340_v27 = vadd.f32 %v1339_v26, %v2208_v40 }
 0x27a   :  { %v1341_v28 = vpop.f32.mrf.mxu1 }
 0x27b   :  { %1403 = vst [vmem:[#allocation8 + $0x1c8] sm:$0xff] %v1340_v27  ;;  %v1342_v29 = vadd.f32 %v1341_v28, %v2204_v45 }
 0x27c   :  { %v1343_v0 = vpop.f32.mrf.mxu1 }
 0x27d   :  { %1404 = vst [vmem:[#allocation8 + $0x1d0] sm:$0xff] %v1342_v29  ;;  %v1344_v37 = vadd.f32 %v1343_v0, %v2208_v40 }
 0x27f   :  { %1405 = vst [vmem:[#allocation8 + $0x1d8] sm:$0xff] %v1344_v37 }
 0x280   :  { %1858 = shalt.err (!%p1855_p5)
}
 0x281   :  { %s1879_s12 = smov 256   ;;  %s1880_s13 = smov 16  }
 0x282   :  { %1417 = dma.vmem_to_hbm [thread:$0]  %s1412_s10, 7680, %s2278_s5, [#allocation4], %s1879_s12, %s1879_s12, %s1880_s13  }
 0x283   :  { %1871 = dma.done.wait [#allocation4], 7680  }
 0x284   :  { %1872 = vsyncadd [#allocation4], 4294959616 }
 0x285   :  { %1421 = vsyncpa [#allocation3], 1 }
 0x286   :  { %1422 = vsyncpa [#allocation6], 1 }
 0x287   :  { %1423 = vsyncpa [#allocation4], 1 }

</bundles_post_ra>
